<compile_context>
chip_gen: v6e
topology: v6e:2x2x1
jax: 0.10.0
libtpu: 0.0.40
codegen_flags: <defaults>
</compile_context>

<pallas_src>
import jax
import jax.numpy as jnp
import numpy as np
from jax import lax
from jax.experimental import pallas as pl
from jax.experimental.pallas import tpu as pltpu


# ------------------------------ fused kernel ------------------------------- #

def _downscaling_kernel(x_ref, w1_ref, b1_ref, w2_ref, b2_ref, o_ref,
                        pad1_ref, pad2_ref):
    # x_ref : (1, H, W, Cin)  one batch element, NHWC
    # w1_ref: (9*Cin, Cmid)   conv1 weights, BN scale pre-folded
    # w2_ref: (9*Cmid, Cout)  conv2 weights, BN scale pre-folded
    # b*_ref: (1, C)          folded BN bias
    # o_ref : (1, Hh*Wh, Cout)
    # pad*  : VMEM scratch for SAME-padding, (Hh+2, Wh+2, C)
    _, H, W, Cin = x_ref.shape
    Hh, Wh = H // 2, W // 2
    Cmid = w1_ref.shape[1]

    x = x_ref[0]                                            # (H, W, Cin)

    # ---- 2x2 max-pool, entirely in VMEM ------------------------------------
    xr = x.reshape(Hh, 2, W, Cin)                           # leading-dim split
    hmax = jnp.maximum(xr[:, 0], xr[:, 1])                  # (Hh, W, Cin)
    cols = [jnp.maximum(hmax[:, 2 * j:2 * j + 1, :],
                        hmax[:, 2 * j + 1:2 * j + 2, :])
            for j in range(Wh)]                             # (Hh, 1, Cin) each
    pooled = jnp.concatenate(cols, axis=1)                  # (Hh, Wh, Cin)

    # ---- conv1 (3x3 SAME) as one im2col matmul, BN folded into weights -----
    pad1_ref[...] = jnp.zeros_like(pad1_ref)
    pad1_ref[1:Hh + 1, 1:Wh + 1, :] = pooled
    p1 = jnp.concatenate(
        [pad1_ref[dy:dy + Hh, dx:dx + Wh, :].reshape(Hh * Wh, Cin)
         for dy in range(3) for dx in range(3)], axis=1)    # (Hh*Wh, 9*Cin)
    y1 = jnp.dot(p1, w1_ref[...], preferred_element_type=jnp.float32)
    y1 = jnp.maximum(y1 + b1_ref[0], 0.0)                   # (Hh*Wh, Cmid)

    # ---- conv2 (3x3 SAME), same structure, input never leaves VMEM ---------
    pad2_ref[...] = jnp.zeros_like(pad2_ref)
    for i in range(Hh):                                     # aligned row slabs
        pad2_ref[1 + i, 1:Wh + 1, :] = y1[i * Wh:(i + 1) * Wh, :]
    p2 = jnp.concatenate(
        [pad2_ref[dy:dy + Hh, dx:dx + Wh, :].reshape(Hh * Wh, Cmid)
         for dy in range(3) for dx in range(3)], axis=1)    # (Hh*Wh, 9*Cmid)
    y2 = jnp.dot(p2, w2_ref[...], preferred_element_type=jnp.float32)
    y2 = jnp.maximum(y2 + b2_ref[0], 0.0)                   # (Hh*Wh, Cout)

    o_ref[0] = y2.astype(o_ref.dtype)


# -------------------------------- wrapper ---------------------------------- #

def downscaling_forward(x_nchw, params):
    """Downscaling.forward: MaxPool2d(2) -> Conv-BN-ReLU -> Conv-BN-ReLU (fused)."""
    B, Cin, H, W = x_nchw.shape
    assert H % 2 == 0 and W % 2 == 0
    Hh, Wh = H // 2, W // 2
    w1f, w2f = params["w1f"], params["w2f"]
    bias1, bias2 = params["bias1"], params["bias2"]
    Cmid, Cout = w1f.shape[1], w2f.shape[1]

    x = jnp.transpose(x_nchw, (0, 2, 3, 1))                 # NCHW -> NHWC (glue)

    out = pl.pallas_call(
        _downscaling_kernel,
        out_shape=jax.ShapeDtypeStruct((B, Hh * Wh, Cout), jnp.float32),
        grid=(B,),
        in_specs=[
            pl.BlockSpec((1, H, W, Cin), lambda b: (b, 0, 0, 0)),
            pl.BlockSpec((9 * Cin, Cmid), lambda b: (0, 0)),
            pl.BlockSpec((1, Cmid), lambda b: (0, 0)),
            pl.BlockSpec((9 * Cmid, Cout), lambda b: (0, 0)),
            pl.BlockSpec((1, Cout), lambda b: (0, 0)),
        ],
        out_specs=pl.BlockSpec((1, Hh * Wh, Cout), lambda b: (b, 0, 0)),
        scratch_shapes=[
            pltpu.VMEM((Hh + 2, Wh + 2, Cin), jnp.float32),   # padded pooled in
            pltpu.VMEM((Hh + 2, Wh + 2, Cmid), jnp.float32),  # padded conv1 out
        ],
        compiler_params=pltpu.CompilerParams(dimension_semantics=("parallel",)),
    )(x, w1f, bias1, w2f, bias2)

    out = out.reshape(B, Hh, Wh, Cout)                      # free reshape
    return jnp.transpose(out, (0, 3, 1, 2))                 # NHWC -> NCHW


# -------------------------------- params ----------------------------------- #

def init_params(key, in_channels, out_channels):
    mid = out_channels  # DoubleConv: mid_channels defaults to out_channels
    eps = 1e-5
    k = jax.random.split(key, 10)

    def bn_fold(kg, kb, km, kv, c):
        gamma = 1.0 + 0.1 * jax.random.normal(kg, (c,), jnp.float32)
        beta = 0.1 * jax.random.normal(kb, (c,), jnp.float32)
        mean = 0.1 * jax.random.normal(km, (c,), jnp.float32)
        var = 1.0 + 0.1 * jnp.abs(jax.random.normal(kv, (c,), jnp.float32))
        scale = gamma / jnp.sqrt(var + eps)
        bias = beta - mean * scale
        return scale, bias

    w1 = 0.1 * jax.random.normal(k[0], (3, 3, in_channels, mid), jnp.float32)
    w2 = 0.1 * jax.random.normal(k[1], (3, 3, mid, out_channels), jnp.float32)
    s1, b1 = bn_fold(k[2], k[3], k[4], k[5], mid)
    s2, b2 = bn_fold(k[6], k[7], k[8], k[9], out_channels)

    # Fold BN scale into the weights (host-side, once) and flatten HWIO to
    # (9*Cin, Cout) matching the kernel's im2col column order (dy, dx, ci).
    w1f = (w1 * s1).reshape(9 * in_channels, mid)
    w2f = (w2 * s2).reshape(9 * mid, out_channels)

    return {
        "w1": w1, "scale1": s1.reshape(1, mid), "bias1": b1.reshape(1, mid),
        "w2": w2, "scale2": s2.reshape(1, out_channels),
        "bias2": b2.reshape(1, out_channels),
        "w1f": w1f, "w2f": w2f,
    }


# ------------------------------- reference ---------------------------------- #

def reference_forward(x_nchw, params):
    x = jnp.transpose(x_nchw, (0, 2, 3, 1))
    x = lax.reduce_window(x, -jnp.inf, lax.max,
                          (1, 2, 2, 1), (1, 2, 2, 1), "VALID")

    def conv(x, w, s, b):
        y = lax.conv_general_dilated(
            x, w, (1, 1), ((1, 1), (1, 1)),
            dimension_numbers=("NHWC", "HWIO", "NHWC"),
            precision=lax.Precision.HIGHEST)
        return jnp.maximum(y * s + b, 0.0)

    x = conv(x, params["w1"], params["scale1"], params["bias1"])
    x = conv(x, params["w2"], params["scale2"], params["bias2"])
    return jnp.transpose(x, (0, 3, 1, 2))


# --------------------------------- main -------------------------------------- #

if __name__ == "__main__":
    key = jax.random.PRNGKey(0)
    kx, kp = jax.random.split(key)

    B, Cin, Cout, H, W = 2, 4, 8, 16, 16
    x = jax.random.normal(kx, (B, Cin, H, W), jnp.float32)   # NCHW like PyTorch
    params = init_params(kp, Cin, Cout)

    out = jax.jit(downscaling_forward)(x, params)
    out = jax.block_until_ready(out)

    assert out.shape == (B, Cout, H // 2, W // 2), out.shape
    ref = reference_forward(x, params)
    np.testing.assert_allclose(np.asarray(out), np.asarray(ref),
                               rtol=1e-3, atol=1e-3)
    print("KERNEL_OK")
</pallas_src>

<mosaic_0001>
module attributes {stable_mosaic.version = 11 : i64} {
  func.func @_downscaling_kernel(%arg0: i32, %arg1: memref<1x16x16x4xf32, #tpu.memory_space<vmem>>, %arg2: memref<36x8xf32, #tpu.memory_space<vmem>>, %arg3: memref<1x8xf32, #tpu.memory_space<vmem>>, %arg4: memref<72x8xf32, #tpu.memory_space<vmem>>, %arg5: memref<1x8xf32, #tpu.memory_space<vmem>>, %arg6: memref<1x64x8xf32, #tpu.memory_space<vmem>>, %arg7: memref<10x10x4xf32, #tpu.memory_space<vmem>>, %arg8: memref<10x10x8xf32, #tpu.memory_space<vmem>>) attributes {dimension_semantics = [#tpu.dimension_semantics<parallel>], iteration_bounds = array<i64: 2>, scalar_prefetch = 0 : i64, scratch_operands = 2 : i64, tpu.core_type = #tpu.core_type<tc>, window_params = [{transform_indices = @transform_0, window_bounds = array<i64: 1, 16, 16, 4>}, {pipeline_mode = #tpu.pipeline_mode<synchronous>, transform_indices = @transform_1, window_bounds = array<i64: 36, 8>}, {pipeline_mode = #tpu.pipeline_mode<synchronous>, transform_indices = @transform_2, window_bounds = array<i64: 1, 8>}, {pipeline_mode = #tpu.pipeline_mode<synchronous>, transform_indices = @transform_3, window_bounds = array<i64: 72, 8>}, {pipeline_mode = #tpu.pipeline_mode<synchronous>, transform_indices = @transform_4, window_bounds = array<i64: 1, 8>}, {transform_indices = @transform_5, window_bounds = array<i64: 1, 64, 8>}]} {
    %c0 = arith.constant 0 : index
    %c0_0 = arith.constant 0 : index
    %c0_1 = arith.constant 0 : index
    %c0_2 = arith.constant 0 : index
    %0 = vector.load %arg1[%c0, %c0_0, %c0_1, %c0_2] : memref<1x16x16x4xf32, #tpu.memory_space<vmem>>, vector<1x16x16x4xf32>
    %1 = vector.shape_cast %0 : vector<1x16x16x4xf32> to vector<16x16x4xf32>
    %2 = vector.shape_cast %1 : vector<16x16x4xf32> to vector<8x2x16x4xf32>
    %3 = vector.extract_strided_slice %2 {offsets = [0, 0, 0, 0], sizes = [8, 1, 16, 4], strides = [1, 1, 1, 1]} : vector<8x2x16x4xf32> to vector<8x1x16x4xf32>
    %4 = vector.shape_cast %3 : vector<8x1x16x4xf32> to vector<8x16x4xf32>
    %5 = vector.extract_strided_slice %2 {offsets = [0, 1, 0, 0], sizes = [8, 1, 16, 4], strides = [1, 1, 1, 1]} : vector<8x2x16x4xf32> to vector<8x1x16x4xf32>
    %6 = vector.shape_cast %5 : vector<8x1x16x4xf32> to vector<8x16x4xf32>
    %7 = arith.maximumf %4, %6 : vector<8x16x4xf32>
    %8 = vector.extract_strided_slice %7 {offsets = [0, 0, 0], sizes = [8, 1, 4], strides = [1, 1, 1]} : vector<8x16x4xf32> to vector<8x1x4xf32>
    %9 = vector.extract_strided_slice %7 {offsets = [0, 1, 0], sizes = [8, 1, 4], strides = [1, 1, 1]} : vector<8x16x4xf32> to vector<8x1x4xf32>
    %10 = arith.maximumf %8, %9 : vector<8x1x4xf32>
    %11 = vector.extract_strided_slice %7 {offsets = [0, 2, 0], sizes = [8, 1, 4], strides = [1, 1, 1]} : vector<8x16x4xf32> to vector<8x1x4xf32>
    %12 = vector.extract_strided_slice %7 {offsets = [0, 3, 0], sizes = [8, 1, 4], strides = [1, 1, 1]} : vector<8x16x4xf32> to vector<8x1x4xf32>
    %13 = arith.maximumf %11, %12 : vector<8x1x4xf32>
    %14 = vector.extract_strided_slice %7 {offsets = [0, 4, 0], sizes = [8, 1, 4], strides = [1, 1, 1]} : vector<8x16x4xf32> to vector<8x1x4xf32>
    %15 = vector.extract_strided_slice %7 {offsets = [0, 5, 0], sizes = [8, 1, 4], strides = [1, 1, 1]} : vector<8x16x4xf32> to vector<8x1x4xf32>
    %16 = arith.maximumf %14, %15 : vector<8x1x4xf32>
    %17 = vector.extract_strided_slice %7 {offsets = [0, 6, 0], sizes = [8, 1, 4], strides = [1, 1, 1]} : vector<8x16x4xf32> to vector<8x1x4xf32>
    %18 = vector.extract_strided_slice %7 {offsets = [0, 7, 0], sizes = [8, 1, 4], strides = [1, 1, 1]} : vector<8x16x4xf32> to vector<8x1x4xf32>
    %19 = arith.maximumf %17, %18 : vector<8x1x4xf32>
    %20 = vector.extract_strided_slice %7 {offsets = [0, 8, 0], sizes = [8, 1, 4], strides = [1, 1, 1]} : vector<8x16x4xf32> to vector<8x1x4xf32>
    %21 = vector.extract_strided_slice %7 {offsets = [0, 9, 0], sizes = [8, 1, 4], strides = [1, 1, 1]} : vector<8x16x4xf32> to vector<8x1x4xf32>
    %22 = arith.maximumf %20, %21 : vector<8x1x4xf32>
    %23 = vector.extract_strided_slice %7 {offsets = [0, 10, 0], sizes = [8, 1, 4], strides = [1, 1, 1]} : vector<8x16x4xf32> to vector<8x1x4xf32>
    %24 = vector.extract_strided_slice %7 {offsets = [0, 11, 0], sizes = [8, 1, 4], strides = [1, 1, 1]} : vector<8x16x4xf32> to vector<8x1x4xf32>
    %25 = arith.maximumf %23, %24 : vector<8x1x4xf32>
    %26 = vector.extract_strided_slice %7 {offsets = [0, 12, 0], sizes = [8, 1, 4], strides = [1, 1, 1]} : vector<8x16x4xf32> to vector<8x1x4xf32>
    %27 = vector.extract_strided_slice %7 {offsets = [0, 13, 0], sizes = [8, 1, 4], strides = [1, 1, 1]} : vector<8x16x4xf32> to vector<8x1x4xf32>
    %28 = arith.maximumf %26, %27 : vector<8x1x4xf32>
    %29 = vector.extract_strided_slice %7 {offsets = [0, 14, 0], sizes = [8, 1, 4], strides = [1, 1, 1]} : vector<8x16x4xf32> to vector<8x1x4xf32>
    %30 = vector.extract_strided_slice %7 {offsets = [0, 15, 0], sizes = [8, 1, 4], strides = [1, 1, 1]} : vector<8x16x4xf32> to vector<8x1x4xf32>
    %31 = arith.maximumf %29, %30 : vector<8x1x4xf32>
    %32 = tpu.concatenate %10, %13, %16, %19, %22, %25, %28, %31 in 1 : vector<8x1x4xf32>, vector<8x1x4xf32>, vector<8x1x4xf32>, vector<8x1x4xf32>, vector<8x1x4xf32>, vector<8x1x4xf32>, vector<8x1x4xf32>, vector<8x1x4xf32> -> vector<8x8x4xf32>
    %cst = arith.constant 0.000000e+00 : f32
    %33 = vector.broadcast %cst : f32 to vector<10x10x4xf32>
    %c0_3 = arith.constant 0 : index
    %c0_4 = arith.constant 0 : index
    %c0_5 = arith.constant 0 : index
    %34 = vector.load %arg7[%c0_3, %c0_4, %c0_5] : memref<10x10x4xf32, #tpu.memory_space<vmem>>, vector<10x10x4xf32>
    tpu.vector_store %arg7[%c0_3, %c0_4, %c0_5], %33 {strides = array<i32>} : memref<10x10x4xf32, #tpu.memory_space<vmem>>, vector<10x10x4xf32>,
    %c1 = arith.constant 1 : index
    %c1_6 = arith.constant 1 : index
    %c0_7 = arith.constant 0 : index
    %35 = vector.load %arg7[%c1, %c1_6, %c0_7] : memref<10x10x4xf32, #tpu.memory_space<vmem>>, vector<8x8x4xf32>
    tpu.vector_store %arg7[%c1, %c1_6, %c0_7], %32 {strides = array<i32>} : memref<10x10x4xf32, #tpu.memory_space<vmem>>, vector<8x8x4xf32>,
    %c0_8 = arith.constant 0 : index
    %c0_9 = arith.constant 0 : index
    %c0_10 = arith.constant 0 : index
    %36 = vector.load %arg7[%c0_8, %c0_9, %c0_10] : memref<10x10x4xf32, #tpu.memory_space<vmem>>, vector<8x8x4xf32>
    %37 = vector.shape_cast %36 : vector<8x8x4xf32> to vector<64x4xf32>
    %c0_11 = arith.constant 0 : index
    %c1_12 = arith.constant 1 : index
    %c0_13 = arith.constant 0 : index
    %38 = vector.load %arg7[%c0_11, %c1_12, %c0_13] : memref<10x10x4xf32, #tpu.memory_space<vmem>>, vector<8x8x4xf32>
    %39 = vector.shape_cast %38 : vector<8x8x4xf32> to vector<64x4xf32>
    %c0_14 = arith.constant 0 : index
    %c2 = arith.constant 2 : index
    %c0_15 = arith.constant 0 : index
    %40 = vector.load %arg7[%c0_14, %c2, %c0_15] : memref<10x10x4xf32, #tpu.memory_space<vmem>>, vector<8x8x4xf32>
    %41 = vector.shape_cast %40 : vector<8x8x4xf32> to vector<64x4xf32>
    %c1_16 = arith.constant 1 : index
    %c0_17 = arith.constant 0 : index
    %c0_18 = arith.constant 0 : index
    %42 = vector.load %arg7[%c1_16, %c0_17, %c0_18] : memref<10x10x4xf32, #tpu.memory_space<vmem>>, vector<8x8x4xf32>
    %43 = vector.shape_cast %42 : vector<8x8x4xf32> to vector<64x4xf32>
    %c1_19 = arith.constant 1 : index
    %c1_20 = arith.constant 1 : index
    %c0_21 = arith.constant 0 : index
    %44 = vector.load %arg7[%c1_19, %c1_20, %c0_21] : memref<10x10x4xf32, #tpu.memory_space<vmem>>, vector<8x8x4xf32>
    %45 = vector.shape_cast %44 : vector<8x8x4xf32> to vector<64x4xf32>
    %c1_22 = arith.constant 1 : index
    %c2_23 = arith.constant 2 : index
    %c0_24 = arith.constant 0 : index
    %46 = vector.load %arg7[%c1_22, %c2_23, %c0_24] : memref<10x10x4xf32, #tpu.memory_space<vmem>>, vector<8x8x4xf32>
    %47 = vector.shape_cast %46 : vector<8x8x4xf32> to vector<64x4xf32>
    %c2_25 = arith.constant 2 : index
    %c0_26 = arith.constant 0 : index
    %c0_27 = arith.constant 0 : index
    %48 = vector.load %arg7[%c2_25, %c0_26, %c0_27] : memref<10x10x4xf32, #tpu.memory_space<vmem>>, vector<8x8x4xf32>
    %49 = vector.shape_cast %48 : vector<8x8x4xf32> to vector<64x4xf32>
    %c2_28 = arith.constant 2 : index
    %c1_29 = arith.constant 1 : index
    %c0_30 = arith.constant 0 : index
    %50 = vector.load %arg7[%c2_28, %c1_29, %c0_30] : memref<10x10x4xf32, #tpu.memory_space<vmem>>, vector<8x8x4xf32>
    %51 = vector.shape_cast %50 : vector<8x8x4xf32> to vector<64x4xf32>
    %c2_31 = arith.constant 2 : index
    %c2_32 = arith.constant 2 : index
    %c0_33 = arith.constant 0 : index
    %52 = vector.load %arg7[%c2_31, %c2_32, %c0_33] : memref<10x10x4xf32, #tpu.memory_space<vmem>>, vector<8x8x4xf32>
    %53 = vector.shape_cast %52 : vector<8x8x4xf32> to vector<64x4xf32>
    %54 = tpu.concatenate %37, %39, %41, %43, %45, %47, %49, %51, %53 in 1 : vector<64x4xf32>, vector<64x4xf32>, vector<64x4xf32>, vector<64x4xf32>, vector<64x4xf32>, vector<64x4xf32>, vector<64x4xf32>, vector<64x4xf32>, vector<64x4xf32> -> vector<64x36xf32>
    %c0_34 = arith.constant 0 : index
    %c0_35 = arith.constant 0 : index
    %55 = vector.load %arg2[%c0_34, %c0_35] : memref<36x8xf32, #tpu.memory_space<vmem>>, vector<36x8xf32>
    %cst_36 = arith.constant dense<0.000000e+00> : vector<64x8xf32>
    %56 = tpu.matmul %54, %55, %cst_36 {dimension_numbers = #tpu.dot_dimension_numbers<[1], [0], [0], [1], [0, 0, 1, 1], [], []>} : vector<64x36xf32>, vector<36x8xf32>, vector<64x8xf32> -> vector<64x8xf32>
    %c0_37 = arith.constant 0 : index
    %c0_38 = arith.constant 0 : index
    %57 = vector.load %arg3[%c0_37, %c0_38] : memref<1x8xf32, #tpu.memory_space<vmem>>, vector<1x8xf32>
    %58 = vector.shape_cast %57 : vector<1x8xf32> to vector<8xf32>
    %59 = vector.shape_cast %58 : vector<8xf32> to vector<1x8xf32>
    %60 = vector.broadcast %59 : vector<1x8xf32> to vector<64x8xf32>
    %61 = arith.addf %56, %60 : vector<64x8xf32>
    %cst_39 = arith.constant 0.000000e+00 : f32
    %62 = vector.broadcast %cst_39 : f32 to vector<64x8xf32>
    %63 = arith.maximumf %61, %62 : vector<64x8xf32>
    %cst_40 = arith.constant 0.000000e+00 : f32
    %64 = vector.broadcast %cst_40 : f32 to vector<10x10x8xf32>
    %c0_41 = arith.constant 0 : index
    %c0_42 = arith.constant 0 : index
    %c0_43 = arith.constant 0 : index
    %65 = vector.load %arg8[%c0_41, %c0_42, %c0_43] : memref<10x10x8xf32, #tpu.memory_space<vmem>>, vector<10x10x8xf32>
    tpu.vector_store %arg8[%c0_41, %c0_42, %c0_43], %64 {strides = array<i32>} : memref<10x10x8xf32, #tpu.memory_space<vmem>>, vector<10x10x8xf32>,
    %66 = vector.extract_strided_slice %63 {offsets = [0, 0], sizes = [8, 8], strides = [1, 1]} : vector<64x8xf32> to vector<8x8xf32>
    %c1_44 = arith.constant 1 : index
    %c1_45 = arith.constant 1 : index
    %c0_46 = arith.constant 0 : index
    %67 = vector.load %arg8[%c1_44, %c1_45, %c0_46] : memref<10x10x8xf32, #tpu.memory_space<vmem>>, vector<1x8x8xf32>
    %68 = vector.shape_cast %67 : vector<1x8x8xf32> to vector<8x8xf32>
    %69 = vector.shape_cast %66 : vector<8x8xf32> to vector<1x8x8xf32>
    tpu.vector_store %arg8[%c1_44, %c1_45, %c0_46], %69 {strides = array<i32>} : memref<10x10x8xf32, #tpu.memory_space<vmem>>, vector<1x8x8xf32>,
    %70 = vector.extract_strided_slice %63 {offsets = [8, 0], sizes = [8, 8], strides = [1, 1]} : vector<64x8xf32> to vector<8x8xf32>
    %c2_47 = arith.constant 2 : index
    %c1_48 = arith.constant 1 : index
    %c0_49 = arith.constant 0 : index
    %71 = vector.load %arg8[%c2_47, %c1_48, %c0_49] : memref<10x10x8xf32, #tpu.memory_space<vmem>>, vector<1x8x8xf32>
    %72 = vector.shape_cast %71 : vector<1x8x8xf32> to vector<8x8xf32>
    %73 = vector.shape_cast %70 : vector<8x8xf32> to vector<1x8x8xf32>
    tpu.vector_store %arg8[%c2_47, %c1_48, %c0_49], %73 {strides = array<i32>} : memref<10x10x8xf32, #tpu.memory_space<vmem>>, vector<1x8x8xf32>,
    %74 = vector.extract_strided_slice %63 {offsets = [16, 0], sizes = [8, 8], strides = [1, 1]} : vector<64x8xf32> to vector<8x8xf32>
    %c3 = arith.constant 3 : index
    %c1_50 = arith.constant 1 : index
    %c0_51 = arith.constant 0 : index
    %75 = vector.load %arg8[%c3, %c1_50, %c0_51] : memref<10x10x8xf32, #tpu.memory_space<vmem>>, vector<1x8x8xf32>
    %76 = vector.shape_cast %75 : vector<1x8x8xf32> to vector<8x8xf32>
    %77 = vector.shape_cast %74 : vector<8x8xf32> to vector<1x8x8xf32>
    tpu.vector_store %arg8[%c3, %c1_50, %c0_51], %77 {strides = array<i32>} : memref<10x10x8xf32, #tpu.memory_space<vmem>>, vector<1x8x8xf32>,
    %78 = vector.extract_strided_slice %63 {offsets = [24, 0], sizes = [8, 8], strides = [1, 1]} : vector<64x8xf32> to vector<8x8xf32>
    %c4 = arith.constant 4 : index
    %c1_52 = arith.constant 1 : index
    %c0_53 = arith.constant 0 : index
    %79 = vector.load %arg8[%c4, %c1_52, %c0_53] : memref<10x10x8xf32, #tpu.memory_space<vmem>>, vector<1x8x8xf32>
    %80 = vector.shape_cast %79 : vector<1x8x8xf32> to vector<8x8xf32>
    %81 = vector.shape_cast %78 : vector<8x8xf32> to vector<1x8x8xf32>
    tpu.vector_store %arg8[%c4, %c1_52, %c0_53], %81 {strides = array<i32>} : memref<10x10x8xf32, #tpu.memory_space<vmem>>, vector<1x8x8xf32>,
    %82 = vector.extract_strided_slice %63 {offsets = [32, 0], sizes = [8, 8], strides = [1, 1]} : vector<64x8xf32> to vector<8x8xf32>
    %c5 = arith.constant 5 : index
    %c1_54 = arith.constant 1 : index
    %c0_55 = arith.constant 0 : index
    %83 = vector.load %arg8[%c5, %c1_54, %c0_55] : memref<10x10x8xf32, #tpu.memory_space<vmem>>, vector<1x8x8xf32>
    %84 = vector.shape_cast %83 : vector<1x8x8xf32> to vector<8x8xf32>
    %85 = vector.shape_cast %82 : vector<8x8xf32> to vector<1x8x8xf32>
    tpu.vector_store %arg8[%c5, %c1_54, %c0_55], %85 {strides = array<i32>} : memref<10x10x8xf32, #tpu.memory_space<vmem>>, vector<1x8x8xf32>,
    %86 = vector.extract_strided_slice %63 {offsets = [40, 0], sizes = [8, 8], strides = [1, 1]} : vector<64x8xf32> to vector<8x8xf32>
    %c6 = arith.constant 6 : index
    %c1_56 = arith.constant 1 : index
    %c0_57 = arith.constant 0 : index
    %87 = vector.load %arg8[%c6, %c1_56, %c0_57] : memref<10x10x8xf32, #tpu.memory_space<vmem>>, vector<1x8x8xf32>
    %88 = vector.shape_cast %87 : vector<1x8x8xf32> to vector<8x8xf32>
    %89 = vector.shape_cast %86 : vector<8x8xf32> to vector<1x8x8xf32>
    tpu.vector_store %arg8[%c6, %c1_56, %c0_57], %89 {strides = array<i32>} : memref<10x10x8xf32, #tpu.memory_space<vmem>>, vector<1x8x8xf32>,
    %90 = vector.extract_strided_slice %63 {offsets = [48, 0], sizes = [8, 8], strides = [1, 1]} : vector<64x8xf32> to vector<8x8xf32>
    %c7 = arith.constant 7 : index
    %c1_58 = arith.constant 1 : index
    %c0_59 = arith.constant 0 : index
    %91 = vector.load %arg8[%c7, %c1_58, %c0_59] : memref<10x10x8xf32, #tpu.memory_space<vmem>>, vector<1x8x8xf32>
    %92 = vector.shape_cast %91 : vector<1x8x8xf32> to vector<8x8xf32>
    %93 = vector.shape_cast %90 : vector<8x8xf32> to vector<1x8x8xf32>
    tpu.vector_store %arg8[%c7, %c1_58, %c0_59], %93 {strides = array<i32>} : memref<10x10x8xf32, #tpu.memory_space<vmem>>, vector<1x8x8xf32>,
    %94 = vector.extract_strided_slice %63 {offsets = [56, 0], sizes = [8, 8], strides = [1, 1]} : vector<64x8xf32> to vector<8x8xf32>
    %c8 = arith.constant 8 : index
    %c1_60 = arith.constant 1 : index
    %c0_61 = arith.constant 0 : index
    %95 = vector.load %arg8[%c8, %c1_60, %c0_61] : memref<10x10x8xf32, #tpu.memory_space<vmem>>, vector<1x8x8xf32>
    %96 = vector.shape_cast %95 : vector<1x8x8xf32> to vector<8x8xf32>
    %97 = vector.shape_cast %94 : vector<8x8xf32> to vector<1x8x8xf32>
    tpu.vector_store %arg8[%c8, %c1_60, %c0_61], %97 {strides = array<i32>} : memref<10x10x8xf32, #tpu.memory_space<vmem>>, vector<1x8x8xf32>,
    %c0_62 = arith.constant 0 : index
    %c0_63 = arith.constant 0 : index
    %c0_64 = arith.constant 0 : index
    %98 = vector.load %arg8[%c0_62, %c0_63, %c0_64] : memref<10x10x8xf32, #tpu.memory_space<vmem>>, vector<8x8x8xf32>
    %99 = vector.shape_cast %98 : vector<8x8x8xf32> to vector<64x8xf32>
    %c0_65 = arith.constant 0 : index
    %c1_66 = arith.constant 1 : index
    %c0_67 = arith.constant 0 : index
    %100 = vector.load %arg8[%c0_65, %c1_66, %c0_67] : memref<10x10x8xf32, #tpu.memory_space<vmem>>, vector<8x8x8xf32>
    %101 = vector.shape_cast %100 : vector<8x8x8xf32> to vector<64x8xf32>
    %c0_68 = arith.constant 0 : index
    %c2_69 = arith.constant 2 : index
    %c0_70 = arith.constant 0 : index
    %102 = vector.load %arg8[%c0_68, %c2_69, %c0_70] : memref<10x10x8xf32, #tpu.memory_space<vmem>>, vector<8x8x8xf32>
    %103 = vector.shape_cast %102 : vector<8x8x8xf32> to vector<64x8xf32>
    %c1_71 = arith.constant 1 : index
    %c0_72 = arith.constant 0 : index
    %c0_73 = arith.constant 0 : index
    %104 = vector.load %arg8[%c1_71, %c0_72, %c0_73] : memref<10x10x8xf32, #tpu.memory_space<vmem>>, vector<8x8x8xf32>
    %105 = vector.shape_cast %104 : vector<8x8x8xf32> to vector<64x8xf32>
    %c1_74 = arith.constant 1 : index
    %c1_75 = arith.constant 1 : index
    %c0_76 = arith.constant 0 : index
    %106 = vector.load %arg8[%c1_74, %c1_75, %c0_76] : memref<10x10x8xf32, #tpu.memory_space<vmem>>, vector<8x8x8xf32>
    %107 = vector.shape_cast %106 : vector<8x8x8xf32> to vector<64x8xf32>
    %c1_77 = arith.constant 1 : index
    %c2_78 = arith.constant 2 : index
    %c0_79 = arith.constant 0 : index
    %108 = vector.load %arg8[%c1_77, %c2_78, %c0_79] : memref<10x10x8xf32, #tpu.memory_space<vmem>>, vector<8x8x8xf32>
    %109 = vector.shape_cast %108 : vector<8x8x8xf32> to vector<64x8xf32>
    %c2_80 = arith.constant 2 : index
    %c0_81 = arith.constant 0 : index
    %c0_82 = arith.constant 0 : index
    %110 = vector.load %arg8[%c2_80, %c0_81, %c0_82] : memref<10x10x8xf32, #tpu.memory_space<vmem>>, vector<8x8x8xf32>
    %111 = vector.shape_cast %110 : vector<8x8x8xf32> to vector<64x8xf32>
    %c2_83 = arith.constant 2 : index
    %c1_84 = arith.constant 1 : index
    %c0_85 = arith.constant 0 : index
    %112 = vector.load %arg8[%c2_83, %c1_84, %c0_85] : memref<10x10x8xf32, #tpu.memory_space<vmem>>, vector<8x8x8xf32>
    %113 = vector.shape_cast %112 : vector<8x8x8xf32> to vector<64x8xf32>
    %c2_86 = arith.constant 2 : index
    %c2_87 = arith.constant 2 : index
    %c0_88 = arith.constant 0 : index
    %114 = vector.load %arg8[%c2_86, %c2_87, %c0_88] : memref<10x10x8xf32, #tpu.memory_space<vmem>>, vector<8x8x8xf32>
    %115 = vector.shape_cast %114 : vector<8x8x8xf32> to vector<64x8xf32>
    %116 = tpu.concatenate %99, %101, %103, %105, %107, %109, %111, %113, %115 in 1 : vector<64x8xf32>, vector<64x8xf32>, vector<64x8xf32>, vector<64x8xf32>, vector<64x8xf32>, vector<64x8xf32>, vector<64x8xf32>, vector<64x8xf32>, vector<64x8xf32> -> vector<64x72xf32>
    %c0_89 = arith.constant 0 : index
    %c0_90 = arith.constant 0 : index
    %117 = vector.load %arg4[%c0_89, %c0_90] : memref<72x8xf32, #tpu.memory_space<vmem>>, vector<72x8xf32>
    %cst_91 = arith.constant dense<0.000000e+00> : vector<64x8xf32>
    %118 = tpu.matmul %116, %117, %cst_91 {dimension_numbers = #tpu.dot_dimension_numbers<[1], [0], [0], [1], [0, 0, 1, 1], [], []>} : vector<64x72xf32>, vector<72x8xf32>, vector<64x8xf32> -> vector<64x8xf32>
    %c0_92 = arith.constant 0 : index
    %c0_93 = arith.constant 0 : index
    %119 = vector.load %arg5[%c0_92, %c0_93] : memref<1x8xf32, #tpu.memory_space<vmem>>, vector<1x8xf32>
    %120 = vector.shape_cast %119 : vector<1x8xf32> to vector<8xf32>
    %121 = vector.shape_cast %120 : vector<8xf32> to vector<1x8xf32>
    %122 = vector.broadcast %121 : vector<1x8xf32> to vector<64x8xf32>
    %123 = arith.addf %118, %122 : vector<64x8xf32>
    %cst_94 = arith.constant 0.000000e+00 : f32
    %124 = vector.broadcast %cst_94 : f32 to vector<64x8xf32>
    %125 = arith.maximumf %123, %124 : vector<64x8xf32>
    %c0_95 = arith.constant 0 : index
    %c0_96 = arith.constant 0 : index
    %c0_97 = arith.constant 0 : index
    %126 = vector.load %arg6[%c0_95, %c0_96, %c0_97] : memref<1x64x8xf32, #tpu.memory_space<vmem>>, vector<1x64x8xf32>
    %127 = vector.shape_cast %126 : vector<1x64x8xf32> to vector<64x8xf32>
    %128 = vector.shape_cast %125 : vector<64x8xf32> to vector<1x64x8xf32>
    tpu.vector_store %arg6[%c0_95, %c0_96, %c0_97], %128 {strides = array<i32>} : memref<1x64x8xf32, #tpu.memory_space<vmem>>, vector<1x64x8xf32>,
    return
  }
  func.func @transform_0(%arg0: i32) -> (i32, i32, i32, i32) {
    %c0_i32 = arith.constant 0 : i32
    %c0_i32_0 = arith.constant 0 : i32
    %c0_i32_1 = arith.constant 0 : i32
    %c0_i32_2 = arith.constant 0 : i32
    return %arg0, %c0_i32, %c0_i32_0, %c0_i32_1 : i32, i32, i32, i32
  }
  func.func @transform_1(%arg0: i32) -> (i32, i32) {
    %c0_i32 = arith.constant 0 : i32
    %c0_i32_0 = arith.constant 0 : i32
    %c0_i32_1 = arith.constant 0 : i32
    return %c0_i32, %c0_i32_0 : i32, i32
  }
  func.func @transform_2(%arg0: i32) -> (i32, i32) {
    %c0_i32 = arith.constant 0 : i32
    %c0_i32_0 = arith.constant 0 : i32
    %c0_i32_1 = arith.constant 0 : i32
    return %c0_i32, %c0_i32_0 : i32, i32
  }
  func.func @transform_3(%arg0: i32) -> (i32, i32) {
    %c0_i32 = arith.constant 0 : i32
    %c0_i32_0 = arith.constant 0 : i32
    %c0_i32_1 = arith.constant 0 : i32
    return %c0_i32, %c0_i32_0 : i32, i32
  }
  func.func @transform_4(%arg0: i32) -> (i32, i32) {
    %c0_i32 = arith.constant 0 : i32
    %c0_i32_0 = arith.constant 0 : i32
    %c0_i32_1 = arith.constant 0 : i32
    return %c0_i32, %c0_i32_0 : i32, i32
  }
  func.func @transform_5(%arg0: i32) -> (i32, i32, i32) {
    %c0_i32 = arith.constant 0 : i32
    %c0_i32_0 = arith.constant 0 : i32
    %c0_i32_1 = arith.constant 0 : i32
    return %arg0, %c0_i32, %c0_i32_0 : i32, i32, i32
  }
}

</mosaic_0001>

<bundles_post_ra>
// kernel: downscaling_forward.1
= control target key start
LH: loop header
LB: loop body
LE: loop exit
PB: predicated region body
PF: predicated region fallthrough
CT: control target
= control target key end

     0   :  { %s1948_s18 = smov 0   ;;  %s2578_s0 = inlined_call_operand.vmem [shape: f32[2,16,16,4], index: 0, kind: input, shape index: {}]   ;;  %s2579_s1 = inlined_call_operand.vmem [shape: f32[36,8], index: 1, kind: input, shape index: {}]   ;;  %s2580_s2 = inlined_call_operand.vmem [shape: f32[1,8], index: 2, kind: input, shape index: {}]   ;;  %s2581_s3 = inlined_call_operand.vmem [shape: f32[72,8], index: 3, kind: input, shape index: {}]   ;;  %s2582_s4 = inlined_call_operand.vmem [shape: f32[1,8], index: 4, kind: input, shape index: {}]   ;;  %s2583_s5 = inlined_call_operand.vmem [shape: f32[2,64,8], index: 5, kind: output, shape index: {}]  }
   0x1 LB: > { %s1762_s19 = sadd.s32 4294967295, %s1903_s18   ;;  %p1766_p0 = scmp.ge.s32.totalorder %s1903_s18, 1  ;;  %s1903_s18 = sphi %s1948_s18, %s15_s18  }
   0x2   : > { %p187_p1 = scmp.lt.s32.totalorder %s1903_s18, 3 }
   0x4   : > { %p188_p2 = pnand %p1766_p0, %p187_p1 }
   0x5   : > { %p215_p3 = scmp.lt.s32.totalorder (!%p188_p2), %s1762_s19, 1  ;;  %s1906_s24 = smov (!%p188_p2), 4  }
   0x6   : > { %191 = sbr.rel (%p188_p2) target bundleno = 854 (0x356), region = 40  ;;  %s1907_s25 = smov (!%p188_p2), 8  }
   0x7   : > { %s1908_s26 = smov (!%p188_p2), 12   ;;  %s1909_s27 = smov (!%p188_p2), 16  }
   0x8   : > { %s1910_s28 = smov (!%p188_p2), 20   ;;  %s1911_s6 = smov (!%p188_p2), 24  }
   0x9   : > { %s1912_s13 = smov (!%p188_p2), 28   ;;  %s1913_s16 = smov (!%p188_p2), 32  }
   0xa   : > { %s1914_s17 = smov (!%p188_p2), 48  }
   0xb   : > { %vm528_vm0 = vcmask 31744   ;;  %vm530_vm1 = vcmask 25600   ;;  %v1905_v0 = vmov 0.0   ;;  %s2585_s19 = smov (!%p215_p3, %s1762_s19), 1  ;;  %vm465_vm2 = vcmask 1040384  }
   0xc   : > { %529 = vst.msk [vmem:[#allocation2] sm:$0xff] %vm528_vm0, %v1905_v0  ;;  %532 = vst.msk [vmem:[#allocation2 + $0x10] sm:$0xff] %vm528_vm0, %v1905_v0  ;;  %s1792_s20 = sshll.u32 %s2585_s19, 8  ;;  %vm474_vm3 = vcmask 1041408   ;;  %vm483_vm4 = vcmask 1042432   ;;  %vm492_vm5 = vcmask 1043456  }
   0xd   : > { %531 = vst.msk [vmem:[#allocation2 + $0x8] sm:$0x3] %vm530_vm1, %v1905_v0  ;;  %533 = vst.msk [vmem:[#allocation2 + $0x18] sm:$0x3] %vm530_vm1, %v1905_v0  ;;  %s2002_s23 = scalar_lea.vmem %s2578_s0, %s1792_s20  ;;  %vm501_vm6 = vcmask 1044480   ;;  %vm510_vm7 = vcmask 1045504  }
   0xe   : > { %534 = vst.msk [vmem:[#allocation2 + $0x20] sm:$0xff] %vm528_vm0, %v1905_v0  ;;  %536 = vst.msk [vmem:[#allocation2 + $0x30] sm:$0xff] %vm528_vm0, %v1905_v0  ;;  %v225_v1 = vld [vmem:[%s2002_s23] sm:$0xff]  ;;  %v226_v2 = vld [vmem:[%s2002_s23 + $0x8] sm:$0xff]  ;;  %vm896_vm8 = vcmask 64512   ;;  %vm519_vm9 = vcmask 1046528  }
   0xf   : > { %535 = vst.msk [vmem:[#allocation2 + $0x28] sm:$0x3] %vm530_vm1, %v1905_v0  ;;  %537 = vst.msk [vmem:[#allocation2 + $0x38] sm:$0x3] %vm530_vm1, %v1905_v0  ;;  %v227_v3 = vld [vmem:[%s2002_s23 + $0x10] sm:$0xff]  ;;  %v228_v6 = vld [vmem:[%s2002_s23 + $0x18] sm:$0xff] }
  0x10   : > { %538 = vst.msk [vmem:[#allocation2 + $0x40] sm:$0xff] %vm528_vm0, %v1905_v0  ;;  %540 = vst.msk [vmem:[#allocation2 + $0x50] sm:$0xff] %vm528_vm0, %v1905_v0  ;;  %v257_v7 = vmax.f32 %v225_v1, %v227_v3  ;;  %v258_v8 = vmax.f32 %v226_v2, %v228_v6  ;;  %v229_v9 = vld [vmem:[%s2002_s23 + $0x20] sm:$0xff]  ;;  %v230_v10 = vld [vmem:[%s2002_s23 + $0x28] sm:$0xff]  ;;  %vm905_vm10 = vcmask 97280   ;;  %vm914_vm11 = vcmask 130048  }
  0x11   : > { %539 = vst.msk [vmem:[#allocation2 + $0x48] sm:$0x3] %vm530_vm1, %v1905_v0  ;;  %541 = vst.msk [vmem:[#allocation2 + $0x58] sm:$0x3] %vm530_vm1, %v1905_v0  ;;  %v231_v12 = vld [vmem:[%s2002_s23 + $0x30] sm:$0xff]  ;;  %v232_v13 = vld [vmem:[%s2002_s23 + $0x38] sm:$0xff] }
  0x12   : > { %542 = vst.msk [vmem:[#allocation2 + $0x60] sm:$0xff] %vm528_vm0, %v1905_v0  ;;  %544 = vst.msk [vmem:[#allocation2 + $0x70] sm:$0xff] %vm528_vm0, %v1905_v0  ;;  %v281_v11 = vrot.slane %v257_v7, 1  ;;  %v233_v14 = vld [vmem:[%s2002_s23 + $0x40] sm:$0xff]  ;;  %v313_v15 = vrot.slane %v258_v8, 1  ;;  %v259_v16 = vmax.f32 %v229_v9, %v231_v12  ;;  %v260_v17 = vmax.f32 %v230_v10, %v232_v13  ;;  %v234_v18 = vld [vmem:[%s2002_s23 + $0x48] sm:$0xff] }
  0x13   : > { %543 = vst.msk [vmem:[#allocation2 + $0x68] sm:$0x3] %vm530_vm1, %v1905_v0  ;;  %545 = vst.msk [vmem:[#allocation2 + $0x78] sm:$0x3] %vm530_vm1, %v1905_v0  ;;  %v235_v19 = vld [vmem:[%s2002_s23 + $0x50] sm:$0xff]  ;;  %v236_v20 = vld [vmem:[%s2002_s23 + $0x58] sm:$0xff] }
  0x14   : > { %546 = vst.msk [vmem:[#allocation2 + $0x80] sm:$0xff] %vm528_vm0, %v1905_v0  ;;  %548 = vst.msk [vmem:[#allocation2 + $0x90] sm:$0xff] %vm528_vm0, %v1905_v0  ;;  %v567_v4 = vld [vmem:[#allocation2 + $0x1] sm:$0xff]  ;;  %v297_v21 = vmax.f32 %v257_v7, %v281_v11  ;;  %v261_v22 = vmax.f32 %v233_v14, %v235_v19  ;;  %v262_v23 = vmax.f32 %v234_v18, %v236_v20  ;;  %v239_v25 = vld [vmem:[%s2002_s23 + $0x70] sm:$0xff]  ;;  %v282_v27 = vrot.slane %v259_v16, 1  ;;  %s1915_s20 = smov 56  }
  0x15   : > { %547 = vst.msk [vmem:[#allocation2 + $0x88] sm:$0x3] %vm530_vm1, %v1905_v0  ;;  %549 = vst.msk [vmem:[#allocation2 + $0x98] sm:$0x3] %vm530_vm1, %v1905_v0  ;;  %v575_v5 = vld [vmem:[#allocation2 + $0x2] sm:$0xff]  ;;  %640 = vrot.lane.b32.xlu0 %v567_v4, %s1906_s24  ;;  %v329_v26 = vmax.f32 %v258_v8, %v313_v15  ;;  %v314_v28 = vrot.slane %v260_v17, 1 }
  0x16   : > { %672 = vrot.lane.b32.xlu1 %v575_v5, %s1907_s25  ;;  %v237_v24 = vld [vmem:[%s2002_s23 + $0x60] sm:$0xff]  ;;  %1112 = vst.msk [vmem:[#allocation3] sm:$0xff] %vm896_vm8, %v1905_v0  ;;  %1115 = vst.msk [vmem:[#allocation3 + $0x10] sm:$0xff] %vm896_vm8, %v1905_v0  ;;  %v345_v30 = vrot.slane %v297_v21, 1  ;;  %v361_v31 = vrot.slane %v297_v21, 2  ;;  %v377_v32 = vrot.slane %v297_v21, 3  ;;  %v298_v41 = vmax.f32 %v259_v16, %v282_v27 }
  0x17   : > { %1117 = vst.msk [vmem:[#allocation3 + $0x20] sm:$0xff] %vm896_vm8, %v1905_v0  ;;  %1119 = vst.msk [vmem:[#allocation3 + $0x30] sm:$0xff] %vm896_vm8, %v1905_v0  ;;  %v263_v29 = vmax.f32 %v237_v24, %v239_v25  ;;  %v283_v33 = vrot.slane %v261_v22, 1  ;;  %v238_v34 = vld [vmem:[%s2002_s23 + $0x68] sm:$0xff]  ;;  %v240_v35 = vld [vmem:[%s2002_s23 + $0x78] sm:$0xff]  ;;  %v401_v36 = vrot.slane %v329_v26, 4  ;;  %v330_v42 = vmax.f32 %v260_v17, %v314_v28 }
  0x18   : > { %1121 = vst.msk [vmem:[#allocation3 + $0x40] sm:$0xff] %vm896_vm8, %v1905_v0  ;;  %1123 = vst.msk [vmem:[#allocation3 + $0x50] sm:$0xff] %vm896_vm8, %v1905_v0  ;;  %v417_v37 = vrot.slane %v329_v26, 5  ;;  %v433_v38 = vrot.slane %v329_v26, 6  ;;  %v449_v39 = vrot.slane %v329_v26, 7  ;;  %v466_v40 = vsel %vm465_vm2, %v297_v21, %v345_v30  ;;  %v241_v1 = vld [vmem:[%s2002_s23 + $0x80] sm:$0xff] }
  0x19   : > { %1125 = vst.msk [vmem:[#allocation3 + $0x60] sm:$0xff] %vm896_vm8, %v1905_v0  ;;  %1127 = vst.msk [vmem:[#allocation3 + $0x70] sm:$0xff] %vm896_vm8, %v1905_v0  ;;  %v299_v43 = vmax.f32 %v261_v22, %v283_v33  ;;  %v475_v44 = vsel %vm474_vm3, %v466_v40, %v361_v31  ;;  %v315_v45 = vrot.slane %v262_v23, 1  ;;  %v264_v46 = vmax.f32 %v238_v34, %v240_v35  ;;  %v242_v6 = vld [vmem:[%s2002_s23 + $0x88] sm:$0xff]  ;;  %v243_v7 = vld [vmem:[%s2002_s23 + $0x90] sm:$0xff] }
  0x1a   : > { %1129 = vst.msk [vmem:[#allocation3 + $0x80] sm:$0xff] %vm896_vm8, %v1905_v0  ;;  %1131 = vst.msk [vmem:[#allocation3 + $0x90] sm:$0xff] %vm896_vm8, %v1905_v0  ;;  %v284_v47 = vrot.slane %v263_v29, 1  ;;  %v484_v48 = vsel %vm483_vm4, %v475_v44, %v377_v32  ;;  %v346_v49 = vrot.slane %v298_v41, 1  ;;  %v362_v50 = vrot.slane %v298_v41, 2  ;;  %v244_v8 = vld [vmem:[%s2002_s23 + $0x98] sm:$0xff] }
  0x1b   : > { %v378_v51 = vrot.slane %v298_v41, 3  ;;  %v493_v52 = vsel %vm492_vm5, %v484_v48, %v401_v36  ;;  %v402_v53 = vrot.slane %v330_v42, 4  ;;  %v418_v54 = vrot.slane %v330_v42, 5  ;;  %v247_v30 = vld [vmem:[%s2002_s23 + $0xb0] sm:$0xff]  ;;  %v246_v35 = vld [vmem:[%s2002_s23 + $0xa8] sm:$0xff]  ;;  %v248_v36 = vld [vmem:[%s2002_s23 + $0xb8] sm:$0xff] }
  0x1c   : > { %v434_v55 = vrot.slane %v330_v42, 6  ;;  %v502_v56 = vsel %vm501_vm6, %v493_v52, %v417_v37  ;;  %v450_v57 = vrot.slane %v330_v42, 7  ;;  %v467_v58 = vsel %vm465_vm2, %v298_v41, %v346_v49  ;;  %v249_v41 = vld [vmem:[%s2002_s23 + $0xc0] sm:$0xff]  ;;  %v250_v42 = vld [vmem:[%s2002_s23 + $0xc8] sm:$0xff] }
  0x1d   : > { %v331_v59 = vmax.f32 %v262_v23, %v315_v45  ;;  %v511_v60 = vsel %vm510_vm7, %v502_v56, %v433_v38  ;;  %v476_v61 = vsel %vm474_vm3, %v467_v58, %v362_v50  ;;  %v347_v62 = vrot.slane %v299_v43, 1  ;;  %v252_v50 = vld [vmem:[%s2002_s23 + $0xd8] sm:$0xff] }
  0x1e   : > { %v363_v63 = vrot.slane %v299_v43, 2  ;;  %v520_v2 = vsel %vm519_vm9, %v511_v60, %v449_v39  ;;  %v485_v3 = vsel %vm483_vm4, %v476_v61, %v378_v51  ;;  %v379_v4 = vrot.slane %v299_v43, 3 }
  0x1f   : > { %v403_v5 = vrot.slane %v331_v59, 4  ;;  %551 = vst.msk [vmem:[#allocation2 + $0x11] sm:$0xff] %vm528_vm0, %v520_v2  ;;  %v494_v9 = vsel %vm492_vm5, %v485_v3, %v402_v53  ;;  %v419_v10 = vrot.slane %v331_v59, 5  ;;  %v435_v11 = vrot.slane %v331_v59, 6 }
  0x20   : > { %v451_v12 = vrot.slane %v331_v59, 7  ;;  %v503_v13 = vsel %vm501_vm6, %v494_v9, %v418_v54  ;;  %v468_v14 = vsel %vm465_vm2, %v299_v43, %v347_v62  ;;  %v300_v15 = vmax.f32 %v263_v29, %v284_v47  ;;  %v245_v29 = vld [vmem:[%s2002_s23 + $0xa0] sm:$0xff]  ;;  %v251_v43 = vld [vmem:[%s2002_s23 + $0xd0] sm:$0xff] }
  0x21   : > { %v316_v16 = vrot.slane %v264_v46, 1  ;;  %v512_v17 = vsel %vm510_vm7, %v503_v13, %v434_v55  ;;  %v477_v18 = vsel %vm474_vm3, %v468_v14, %v363_v63  ;;  %v265_v19 = vmax.f32 %v241_v1, %v243_v7 }
  0x22   : > { %v266_v20 = vmax.f32 %v242_v6, %v244_v8  ;;  %v521_v21 = vsel %vm519_vm9, %v512_v17, %v450_v57  ;;  %v486_v22 = vsel %vm483_vm4, %v477_v18, %v379_v4  ;;  %v348_v24 = vrot.slane %v300_v15, 1 }
  0x23   : > { %v332_v23 = vmax.f32 %v264_v46, %v316_v16  ;;  %552 = vst.msk [vmem:[#allocation2 + $0x21] sm:$0xff] %vm528_vm0, %v521_v21  ;;  %v495_v25 = vsel %vm492_vm5, %v486_v22, %v403_v5  ;;  %v364_v26 = vrot.slane %v300_v15, 2  ;;  %v380_v27 = vrot.slane %v300_v15, 3 }
  0x24   : > { %v285_v28 = vrot.slane %v265_v19, 1  ;;  %v504_v31 = vsel %vm501_vm6, %v495_v25, %v419_v10  ;;  %v469_v39 = vsel %vm465_vm2, %v300_v15, %v348_v24  ;;  %v317_v48 = vrot.slane %v266_v20, 1 }
  0x25   : > { %v404_v32 = vrot.slane %v332_v23, 4  ;;  %v420_v33 = vrot.slane %v332_v23, 5  ;;  %v436_v34 = vrot.slane %v332_v23, 6  ;;  %v513_v37 = vsel %vm510_vm7, %v504_v31, %v435_v11 }
  0x26   : > { %v452_v38 = vrot.slane %v332_v23, 7  ;;  %v301_v40 = vmax.f32 %v265_v19, %v285_v28  ;;  %v2076_v44 = vld [vmem:[#allocation2 + $0x12] sm:$0xff]  ;;  %v522_v46 = vsel %vm519_vm9, %v513_v37, %v451_v12  ;;  %v478_v47 = vsel %vm474_vm3, %v469_v39, %v364_v26  ;;  %v253_v19 = vld [vmem:[%s2002_s23 + $0xe0] sm:$0xff] }
  0x27   : > { %v568_v45 = vld [vmem:[#allocation2 + $0x11] sm:$0xff]  ;;  %v267_v49 = vmax.f32 %v245_v29, %v247_v30  ;;  %674 = vrot.lane.b32.xlu1 %v2076_v44, %s1907_s25  ;;  %553 = vst.msk [vmem:[#allocation2 + $0x31] sm:$0xff] %vm528_vm0, %v522_v46  ;;  %v487_v51 = vsel %vm483_vm4, %v478_v47, %v380_v27  ;;  %v333_v57 = vmax.f32 %v266_v20, %v317_v48  ;;  %vm923_vm12 = vcmask 162816  }
  0x28   : > { %642 = vrot.lane.b32.xlu0 %v568_v45, %s1906_s24  ;;  %v349_v52 = vrot.slane %v301_v40, 1  ;;  %v365_v53 = vrot.slane %v301_v40, 2  ;;  %v381_v54 = vrot.slane %v301_v40, 3  ;;  %v2086_v55 = vld [vmem:[#allocation2 + $0x10] sm:$0xff]  ;;  %v496_v56 = vsel %vm492_vm5, %v487_v51, %v404_v32 }
  0x29   : > { %v268_v58 = vmax.f32 %v246_v35, %v248_v36  ;;  %v286_v59 = vrot.slane %v267_v49, 1  ;;  %v505_v60 = vsel %vm501_vm6, %v496_v56, %v420_v33  ;;  %v269_v62 = vmax.f32 %v249_v41, %v251_v43  ;;  %v255_v20 = vld [vmem:[%s2002_s23 + $0xf0] sm:$0xff]  ;;  %v254_v35 = vld [vmem:[%s2002_s23 + $0xe8] sm:$0xff]  ;;  %v256_v36 = vld [vmem:[%s2002_s23 + $0xf8] sm:$0xff]  ;;  %s1916_s23 = smov 40  }
  0x2a   : > { %v470_v61 = vsel %vm465_vm2, %v301_v40, %v349_v52  ;;  %v270_v63 = vmax.f32 %v250_v42, %v252_v50  ;;  %v2091_v1 = vld [vmem:[#allocation2 + $0x20] sm:$0xff]  ;;  %v514_v2 = vsel %vm510_vm7, %v505_v60, %v436_v34  ;;  %v405_v3 = vrot.slane %v333_v57, 4 }
  0x2b   : > { %v421_v4 = vrot.slane %v333_v57, 5  ;;  %v437_v5 = vrot.slane %v333_v57, 6  ;;  %706 = vrot.lane.b32.xlu1 %v2091_v1, %s1908_s26  ;;  %v523_v6 = vsel %vm519_vm9, %v514_v2, %v452_v38  ;;  %v453_v7 = vrot.slane %v333_v57, 7  ;;  %v2100_v10 = vld [vmem:[#allocation2 + $0x21] sm:$0xff] }
  0x2c   : > { %704 = vrot.lane.b32.xlu0 %v2086_v55, %s1908_s26  ;;  %v479_v8 = vsel %vm474_vm3, %v470_v61, %v365_v53  ;;  %v302_v9 = vmax.f32 %v267_v49, %v286_v59  ;;  %554 = vst.msk [vmem:[#allocation2 + $0x41] sm:$0xff] %vm528_vm0, %v523_v6  ;;  %v318_v12 = vrot.slane %v268_v58, 1  ;;  %v287_v13 = vrot.slane %v269_v62, 1  ;;  %v2125_v46 = vld [vmem:[#allocation2 + $0x22] sm:$0xff] }
  0x2d   : > { %v488_v11 = vsel %vm483_vm4, %v479_v8, %v381_v54  ;;  %v319_v14 = vrot.slane %v270_v63, 1  ;;  %v271_v30 = vmax.f32 %v253_v19, %v255_v20  ;;  %v272_v50 = vmax.f32 %v254_v35, %v256_v36 }
  0x2e   : > { %v497_v15 = vsel %vm492_vm5, %v488_v11, %v405_v3  ;;  %v350_v16 = vrot.slane %v302_v9, 1  ;;  %v366_v17 = vrot.slane %v302_v9, 2  ;;  %v382_v18 = vrot.slane %v302_v9, 3  ;;  %v2127_v47 = vld [vmem:[#allocation2 + $0x31] sm:$0xff] }
  0x2f   : > { %v506_v21 = vsel %vm501_vm6, %v497_v15, %v421_v4  ;;  %v334_v22 = vmax.f32 %v268_v58, %v318_v12  ;;  %v303_v23 = vmax.f32 %v269_v62, %v287_v13  ;;  %v335_v24 = vmax.f32 %v270_v63, %v319_v14  ;;  %644 = vrot.lane.b32.xlu1 %v2100_v10, %s1906_s24  ;;  %v2152_v8 = vld [vmem:[#allocation2 + $0x30] sm:$0xff] }
  0x30   : > { %736 = vrot.lane.b32.xlu0 %v568_v45, %s1909_s27  ;;  %v515_v25 = vsel %vm510_vm7, %v506_v21, %v437_v5  ;;  %v471_v26 = vsel %vm465_vm2, %v302_v9, %v350_v16  ;;  %v288_v51 = vrot.slane %v271_v30, 1  ;;  %v320_v58 = vrot.slane %v272_v50, 1  ;;  %v963_v5 = vld [vmem:[%s2579_s1 + $0x20] sm:$0xf]  ;;  %v578_v9 = vld [vmem:[#allocation2 + $0x32] sm:$0xff]  ;;  %v960_v21 = vld [vmem:[%s2579_s1 + $0x8] sm:$0xff] }
  0x31   : > { %v524_v27 = vsel %vm519_vm9, %v515_v25, %v453_v7  ;;  %v406_v28 = vrot.slane %v334_v22, 4  ;;  %v422_v29 = vrot.slane %v334_v22, 5  ;;  %v438_v31 = vrot.slane %v334_v22, 6  ;;  %1824 = vmatprep.subr.msk.mxu0 %vm492_vm5, %v963_v5 }
  0x32   : > { %555 = vst.msk [vmem:[#allocation2 + $0x51] sm:$0xff] %vm528_vm0, %v524_v27  ;;  %v480_v32 = vsel %vm474_vm3, %v471_v26, %v366_v17  ;;  %v351_v33 = vrot.slane %v303_v23, 1  ;;  %v367_v34 = vrot.slane %v303_v23, 2  ;;  %v454_v37 = vrot.slane %v334_v22, 7  ;;  %1825 = vmatpush3.msk.msra.mxu0 %vm492_vm5, %v963_v5  ;;  %v962_v17 = vld [vmem:[%s2579_s1 + $0x18] sm:$0xff] }
  0x33   : > { %v489_v38 = vsel %vm483_vm4, %v480_v32, %v382_v18  ;;  %v383_v39 = vrot.slane %v303_v23, 3  ;;  %v407_v40 = vrot.slane %v335_v24, 4  ;;  %768 = vrot.lane.b32.xlu1 %v2076_v44, %s1910_s28  ;;  %v423_v42 = vrot.slane %v335_v24, 5  ;;  %v961_v18 = vld [vmem:[%s2579_s1 + $0x10] sm:$0xff]  ;;  %1826 = vmatprep.subr.mxu0 %v962_v17  ;;  %v2179_v22 = vld [vmem:[#allocation2 + $0x40] sm:$0xff] }
  0x34   : > { %738 = vrot.lane.b32.xlu0 %v2100_v10, %s1909_s27  ;;  %v498_v41 = vsel %vm492_vm5, %v489_v38, %v406_v28  ;;  %v439_v43 = vrot.slane %v335_v24, 6  ;;  %v472_v45 = vsel %vm465_vm2, %v303_v23, %v351_v33  ;;  %v455_v52 = vrot.slane %v335_v24, 7  ;;  %1827 = vmatpush3.msra.mxu0 %v962_v17  ;;  %v959_v23 = vld [vmem:[%s2579_s1] sm:$0xff] }
  0x35   : > { %v507_v48 = vsel %vm501_vm6, %v498_v41, %v422_v29  ;;  %v481_v49 = vsel %vm474_vm3, %v472_v45, %v367_v34  ;;  %v304_v57 = vmax.f32 %v271_v30, %v288_v51  ;;  %v336_v61 = vmax.f32 %v272_v50, %v320_v58  ;;  %1828 = vmatprep.subr.mxu0 %v961_v18  ;;  %v579_v24 = vld [vmem:[#allocation2 + $0x42] sm:$0xff] }
  0x36   : > { %v516_v44 = vsel %vm510_vm7, %v507_v48, %v438_v31  ;;  %v490_v53 = vsel %vm483_vm4, %v481_v49, %v383_v39  ;;  %1829 = vmatpush3.msra.mxu0 %v961_v18  ;;  %v615_v39 = vld [vmem:[#allocation2 + $0x90] sm:$0xff]  ;;  %vm932_vm13 = vcmask 195584   ;;  %vm941_vm14 = vcmask 228352  }
  0x37   : > { %v525_v54 = vsel %vm519_vm9, %v516_v44, %v454_v37  ;;  %v499_v56 = vsel %vm492_vm5, %v490_v53, %v407_v40  ;;  %676 = vrot.lane.b32.xlu1 %v2125_v46, %s1907_s25  ;;  %v352_v62 = vrot.slane %v304_v57, 1  ;;  %v368_v63 = vrot.slane %v304_v57, 2  ;;  %1830 = vmatprep.subr.mxu0 %v960_v21  ;;  %v623_v40 = vld [vmem:[#allocation2 + $0x91] sm:$0xff] }
  0x38   : > { %646 = vrot.lane.b32.xlu0 %v2127_v47, %s1906_s24  ;;  %556 = vst.msk [vmem:[#allocation2 + $0x61] sm:$0xff] %vm528_vm0, %v525_v54  ;;  %v508_v59 = vsel %vm501_vm6, %v499_v56, %v423_v42  ;;  %v384_v3 = vrot.slane %v304_v57, 3  ;;  %v408_v4 = vrot.slane %v336_v61, 4  ;;  %v424_v6 = vrot.slane %v336_v61, 5  ;;  %1831 = vmatpush3.msra.mxu0 %v960_v21 }
  0x39   : > { %v517_v60 = vsel %vm510_vm7, %v508_v59, %v439_v43  ;;  %v473_v7 = vsel %vm465_vm2, %v304_v57, %v352_v62  ;;  %v440_v11 = vrot.slane %v336_v61, 6  ;;  %v456_v13 = vrot.slane %v336_v61, 7  ;;  %1832 = vmatprep.subr.mxu0 %v959_v23  ;;  %v572_v25 = vld [vmem:[#allocation2 + $0x51] sm:$0xff]  ;;  %v559_v57 = vld [vmem:[#allocation2] sm:$0xff] }
  0x3a   : > { %v526_v2 = vsel %vm519_vm9, %v517_v60, %v455_v52  ;;  %v482_v12 = vsel %vm474_vm3, %v473_v7, %v368_v63  ;;  %1833 = vmatpush3.msra.mxu0 %v959_v23  ;;  %v2201_v26 = vld [vmem:[#allocation2 + $0x50] sm:$0xff]  ;;  %vm950_vm15 = vcmask 261120   ;;  %vm971_vm1 = vcmask 293888  }
  0x3b   : > { %557 = vst.msk [vmem:[#allocation2 + $0x71] sm:$0xff] %vm528_vm0, %v526_v2  ;;  %800 = vrot.lane.b32.xlu1 %v2091_v1, %s1911_s6  ;;  %v491_v14 = vsel %vm483_vm4, %v482_v12, %v384_v3  ;;  %v580_v27 = vld [vmem:[#allocation2 + $0x52] sm:$0xff]  ;;  %vm1113_vm2 = vcmask 58368   ;;  %vm1518_vm3 = vcmask 392192   ;;  %vm1527_vm4 = vcmask 457728  }
  0x3c   : > { %770 = vrot.lane.b32.xlu0 %v2125_v46, %s1910_s28  ;;  %v500_v15 = vsel %vm492_vm5, %v491_v14, %v408_v4  ;;  %v631_v43 = vld [vmem:[#allocation2 + $0x92] sm:$0xff]  ;;  %1118 = vst.msk [vmem:[#allocation3 + $0x28] sm:$0x3] %vm1113_vm2, %v1905_v0  ;;  %1114 = vst.msk [vmem:[#allocation3 + $0x8] sm:$0x3] %vm1113_vm2, %v1905_v0  ;;  %vm1536_vm5 = vcmask 523264  }
  0x3d   : > { %v509_v16 = vsel %vm501_vm6, %v500_v15, %v424_v6  ;;  %1116 = vst.msk [vmem:[#allocation3 + $0x18] sm:$0x3] %vm1113_vm2, %v1905_v0  ;;  %1120 = vst.msk [vmem:[#allocation3 + $0x38] sm:$0x3] %vm1113_vm2, %v1905_v0  ;;  %vm1561_vm6 = vcmask 588800  }
  0x3e   : > { %v518_v19 = vsel %vm510_vm7, %v509_v16, %v440_v11  ;;  %1122 = vst.msk [vmem:[#allocation3 + $0x48] sm:$0x3] %vm1113_vm2, %v1905_v0  ;;  %1124 = vst.msk [vmem:[#allocation3 + $0x58] sm:$0x3] %vm1113_vm2, %v1905_v0 }
  0x3f   : > { %708 = vrot.lane.b32.xlu1 %v2152_v8, %s1908_s26  ;;  %v527_v20 = vsel %vm519_vm9, %v518_v19, %v456_v13  ;;  %v2209_v28 = vld [vmem:[#allocation2 + $0x60] sm:$0xff]  ;;  %1126 = vst.msk [vmem:[#allocation3 + $0x68] sm:$0x3] %vm1113_vm2, %v1905_v0  ;;  %1128 = vst.msk [vmem:[#allocation3 + $0x78] sm:$0x3] %vm1113_vm2, %v1905_v0 }
  0x40   : > { %678 = vrot.lane.b32.xlu0 %v578_v9, %s1907_s25  ;;  %558 = vst.msk [vmem:[#allocation2 + $0x81] sm:$0xff] %vm528_vm0, %v527_v20  ;;  %v596_v29 = vld [vmem:[#allocation2 + $0x61] sm:$0xff] }
  0x41   : > { %v581_v30 = vld [vmem:[#allocation2 + $0x62] sm:$0xff]  ;;  %1130 = vst.msk [vmem:[#allocation3 + $0x88] sm:$0x3] %vm1113_vm2, %v1905_v0  ;;  %1132 = vst.msk [vmem:[#allocation3 + $0x98] sm:$0x3] %vm1113_vm2, %v1905_v0 }
  0x42   : > { %v574_v31 = vld [vmem:[#allocation2 + $0x71] sm:$0xff] }
  0x43   : > { %832 = vrot.lane.b32.xlu1 %v2100_v10, %s1912_s13  ;;  %v594_v10 = vld [vmem:[#allocation2 + $0x41] sm:$0xff]  ;;  %v2225_v32 = vld [vmem:[#allocation2 + $0x70] sm:$0xff] }
  0x44   : > { %802 = vrot.lane.b32.xlu0 %v2152_v8, %s1911_s6  ;;  %v582_v33 = vld [vmem:[#allocation2 + $0x72] sm:$0xff] }
  0x47   : > { %740 = vrot.lane.b32.xlu1 %v2127_v47, %s1909_s27  ;;  %v590_v34 = vld [vmem:[#allocation2 + $0x80] sm:$0xff] }
  0x48   : > { %710 = vrot.lane.b32.xlu0 %v2179_v22, %s1908_s26  ;;  %v598_v35 = vld [vmem:[#allocation2 + $0x81] sm:$0xff] }
  0x49   : > { %v606_v36 = vld [vmem:[#allocation2 + $0x82] sm:$0xff] }
  0x4b   : > { %864 = vrot.lane.b32.xlu1 %v2125_v46, %s1913_s16 }
  0x4c   : > { %834 = vrot.lane.b32.xlu0 %v2127_v47, %s1912_s13 }
  0x4f   : > { %742 = vrot.lane.b32.xlu1 %v594_v10, %s1909_s27 }
  0x50   : > { %648 = vrot.lane.b32.xlu0 %v594_v10, %s1906_s24 }
  0x53   : > { %866 = vrot.lane.b32.xlu1 %v578_v9, %s1913_s16 }
  0x54   : > { %772 = vrot.lane.b32.xlu0 %v578_v9, %s1910_s28 }
  0x57   : > { %680 = vrot.lane.b32.xlu1 %v579_v24, %s1907_s25 }
  0x58   : > { %650 = vrot.lane.b32.xlu0 %v572_v25, %s1906_s24 }
  0x5b   : > { %804 = vrot.lane.b32.xlu1 %v2179_v22, %s1911_s6 }
  0x5c   : > { %774 = vrot.lane.b32.xlu0 %v579_v24, %s1910_s28 }
  0x5f   : > { %712 = vrot.lane.b32.xlu1 %v2201_v26, %s1908_s26 }
  0x60   : > { %682 = vrot.lane.b32.xlu0 %v580_v27, %s1907_s25 }
  0x63   : > { %836 = vrot.lane.b32.xlu1 %v594_v10, %s1912_s13 }
  0x64   : > { %806 = vrot.lane.b32.xlu0 %v2201_v26, %s1911_s6 }
  0x67   : > { %744 = vrot.lane.b32.xlu1 %v572_v25, %s1909_s27 }
  0x68   : > { %714 = vrot.lane.b32.xlu0 %v2209_v28, %s1908_s26 }
  0x6b   : > { %868 = vrot.lane.b32.xlu1 %v579_v24, %s1913_s16 }
  0x6c   : > { %838 = vrot.lane.b32.xlu0 %v572_v25, %s1912_s13 }
  0x6f   : > { %746 = vrot.lane.b32.xlu1 %v596_v29, %s1909_s27 }
  0x70   : > { %652 = vrot.lane.b32.xlu0 %v596_v29, %s1906_s24 }
  0x73   : > { %870 = vrot.lane.b32.xlu1 %v580_v27, %s1913_s16 }
  0x74   : > { %776 = vrot.lane.b32.xlu0 %v580_v27, %s1910_s28 }
  0x77   : > { %684 = vrot.lane.b32.xlu1 %v581_v30, %s1907_s25 }
  0x78   : > { %654 = vrot.lane.b32.xlu0 %v574_v31, %s1906_s24  ;;  %s1917_s24 = smov 64  }
  0x7b   : > { %808 = vrot.lane.b32.xlu1 %v2209_v28, %s1911_s6 }
  0x7c   : > { %778 = vrot.lane.b32.xlu0 %v581_v30, %s1910_s28 }
  0x7f   : > { %716 = vrot.lane.b32.xlu1 %v2225_v32, %s1908_s26 }
  0x80   : > { %686 = vrot.lane.b32.xlu0 %v582_v33, %s1907_s25 }
  0x83   : > { %840 = vrot.lane.b32.xlu1 %v596_v29, %s1912_s13 }
  0x84   : > { %810 = vrot.lane.b32.xlu0 %v2225_v32, %s1911_s6 }
  0x87   : > { %748 = vrot.lane.b32.xlu1 %v574_v31, %s1909_s27  ;;  %v641_v37 = vpop.permute.xlu0 %640 }
  0x88   : > { %718 = vrot.lane.b32.xlu0 %v590_v34, %s1908_s26  ;;  %v673_v38 = vpop.permute.xlu1 %672  ;;  %v888_v58 = vsel %vm528_vm0, %v559_v57, %v641_v37 }
  0x89   : > { %v897_v61 = vsel %vm896_vm8, %v888_v58, %v673_v38 }
  0x8b   : > { %872 = vrot.lane.b32.xlu1 %v581_v30, %s1913_s16 }
  0x8c   : > { %842 = vrot.lane.b32.xlu0 %v574_v31, %s1912_s13 }
  0x8f   : > { %780 = vrot.lane.b32.xlu1 %v582_v33, %s1910_s28 }
  0x90   : > { %750 = vrot.lane.b32.xlu0 %v598_v35, %s1909_s27 }
  0x93   : > { %782 = vrot.lane.b32.xlu1 %v606_v36, %s1910_s28 }
  0x94   : > { %874 = vrot.lane.b32.xlu0 %v582_v33, %s1913_s16 }
  0x97   : > { %814 = vrot.lane.b32.xlu1 %v615_v39, %s1911_s6 }
  0x98   : > { %812 = vrot.lane.b32.xlu0 %v590_v34, %s1911_s6 }
  0x99   : > { %v675_v41 = vpop.permute.xlu1 %674 }
  0x9a   : > { %v643_v42 = vpop.permute.xlu0 %642 }
  0x9b   : > { %846 = vrot.lane.b32.xlu1 %v623_v40, %s1912_s13  ;;  %v889_v6 = vsel %vm528_vm0, %v2086_v55, %v643_v42 }
  0x9c   : > { %844 = vrot.lane.b32.xlu0 %v598_v35, %s1912_s13  ;;  %v898_v13 = vsel %vm896_vm8, %v889_v6, %v675_v41 }
  0x9d   : > { %v707_v45 = vpop.permute.xlu1 %706 }
  0x9e   : > { %v705_v46 = vpop.permute.xlu0 %704  ;;  %v907_v14 = vsel %vm905_vm10, %v898_v13, %v707_v45 }
  0x9f   : > { %878 = vrot.lane.b32.xlu1 %v631_v43, %s1913_s16  ;;  %v906_v62 = vsel %vm905_vm10, %v897_v61, %v705_v46 }
  0xa0   : > { %876 = vrot.lane.b32.xlu0 %v606_v36, %s1913_s16 }
  0xa1   : > { %v645_v47 = vpop.permute.xlu1 %644 }
  0xa2   : > { %v737_v48 = vpop.permute.xlu0 %736  ;;  %v890_v34 = vsel %vm528_vm0, %v2091_v1, %v645_v47 }
  0xa3   : > { %v915_v3 = vsel %vm914_vm11, %v906_v62, %v737_v48 }
  0xa5   : > { %v769_v49 = vpop.permute.xlu1 %768 }
  0xa6   : > { %v739_v50 = vpop.permute.xlu0 %738  ;;  %v924_v4 = vsel %vm923_vm12, %v915_v3, %v769_v49 }
  0xa7   : > { %v916_v17 = vsel %vm914_vm11, %v907_v14, %v739_v50 }
  0xa9   : > { %v677_v51 = vpop.permute.xlu1 %676 }
  0xaa   : > { %v647_v44 = vpop.permute.xlu0 %646  ;;  %v899_v35 = vsel %vm896_vm8, %v890_v34, %v677_v51  ;;  %v1157_v34 = vld [vmem:[#allocation3 + $0x1] sm:$0xff] }
  0xab   : > { %v891_v1 = vsel %vm528_vm0, %v2152_v8, %v647_v44  ;;  %1229 = vrot.lane.b32.xlu0 %v1157_v34, %s1907_s25 }
  0xad   : > { %v801_v52 = vpop.permute.xlu1 %800 }
  0xae   : > { %v771_v53 = vpop.permute.xlu0 %770  ;;  %v933_v5 = vsel %vm932_vm13, %v924_v4, %v801_v52 }
  0xaf   : > { %v925_v18 = vsel %vm923_vm12, %v916_v17, %v771_v53 }
  0xb1   : > { %v709_v54 = vpop.permute.xlu1 %708 }
  0xb2   : > { %v679_v56 = vpop.permute.xlu0 %678  ;;  %v908_v36 = vsel %vm905_vm10, %v899_v35, %v709_v54 }
  0xb3   : > { %v900_v47 = vsel %vm896_vm8, %v891_v1, %v679_v56 }
  0xb5   : > { %v833_v59 = vpop.permute.xlu1 %832 }
  0xb6   : > { %v803_v60 = vpop.permute.xlu0 %802  ;;  %v942_v7 = vsel %vm941_vm14, %v933_v5, %v833_v59 }
  0xb7   : > { %v934_v55 = vsel %vm932_vm13, %v925_v18, %v803_v60 }
  0xb9   : > { %v741_v63 = vpop.permute.xlu1 %740 }
  0xba   : > { %v711_v2 = vpop.permute.xlu0 %710  ;;  %v917_v39 = vsel %vm914_vm11, %v908_v36, %v741_v63 }
  0xbb   : > { %v909_v48 = vsel %vm905_vm10, %v900_v47, %v711_v2 }
  0xbd   : > { %v865_v9 = vpop.permute.xlu1 %864 }
  0xbe   : > { %v835_v11 = vpop.permute.xlu0 %834  ;;  %v951_v12 = vsel %vm950_vm15, %v942_v7, %v865_v9 }
  0xbf   : > { %1834 = vmatprep.mubr.msk.f32.mxu0 %vm971_vm1, %v951_v12  ;;  %v943_v19 = vsel %vm941_vm14, %v934_v55, %v835_v11 }
  0xc1   : > { %v743_v15 = vpop.permute.xlu1 %742 }
  0xc2   : > { %v649_v16 = vpop.permute.xlu0 %648  ;;  %v918_v51 = vsel %vm914_vm11, %v909_v48, %v743_v15 }
  0xc3   : > { %v892_v3 = vsel %vm528_vm0, %v2179_v22, %v649_v16 }
  0xc5   : > { %v867_v20 = vpop.permute.xlu1 %866 }
  0xc6   : > { %v773_v21 = vpop.permute.xlu0 %772  ;;  %v952_v23 = vsel %vm950_vm15, %v943_v19, %v867_v20 }
  0xc7   : > { %1835 = vmatmul.mubr.msk.f32.vlgmr.msra.gmra.mxu0 %vm971_vm1, %v952_v23  ;;  %v926_v40 = vsel %vm923_vm12, %v917_v39, %v773_v21 }
  0xc9   : > { %v681_v10 = vpop.permute.xlu1 %680 }
  0xca   : > { %v651_v24 = vpop.permute.xlu0 %650  ;;  %v901_v4 = vsel %vm896_vm8, %v892_v3, %v681_v10 }
  0xcb   : > { %v893_v22 = vsel %vm528_vm0, %v2201_v26, %v651_v24 }
  0xcd   : > { %v805_v25 = vpop.permute.xlu1 %804 }
  0xce   : > { %v775_v27 = vpop.permute.xlu0 %774  ;;  %v935_v41 = vsel %vm932_vm13, %v926_v40, %v805_v25  ;;  %v1212_v40 = vld [vmem:[#allocation3 + $0x91] sm:$0xff] }
  0xcf   : > { %v927_v52 = vsel %vm923_vm12, %v918_v51, %v775_v27 }
  0xd1   : > { %v713_v29 = vpop.permute.xlu1 %712 }
  0xd2   : > { %v683_v30 = vpop.permute.xlu0 %682  ;;  %v910_v5 = vsel %vm905_vm10, %v901_v4, %v713_v29 }
  0xd3   : > { %v902_v16 = vsel %vm896_vm8, %v893_v22, %v683_v30  ;;  %v1549_v22 = vld [vmem:[%s2581_s3 + $0x20] sm:$0xff] }
  0xd5   : > { %v837_v31 = vpop.permute.xlu1 %836 }
  0xd6   : > { %v807_v33 = vpop.permute.xlu0 %806  ;;  %v944_v42 = vsel %vm941_vm14, %v935_v41, %v837_v31  ;;  %v1165_v41 = vld [vmem:[#allocation3 + $0x2] sm:$0xff] }
  0xd7   : > { %v936_v53 = vsel %vm932_vm13, %v927_v52, %v807_v33  ;;  %v1204_v33 = vld [vmem:[#allocation3 + $0x90] sm:$0xff]  ;;  %1261 = vrot.lane.b32.xlu0 %v1165_v41, %s1909_s27  ;;  %v2343_v52 = vld [vmem:[%s2580_s2] ss:$0 sm:$0xff] }
  0xd8   : > { %1403 = vrot.lane.b32.xlu1 %v1204_v33, %s1914_s17 }
  0xd9   : > { %v745_v37 = vpop.permute.xlu1 %744 }
  0xda   : > { %v715_v38 = vpop.permute.xlu0 %714  ;;  %v919_v9 = vsel %vm914_vm11, %v910_v5, %v745_v37 }
  0xdb   : > { %v911_v18 = vsel %vm905_vm10, %v902_v16, %v715_v38 }
  0xdc   : > { %1435 = vrot.lane.b32.xlu1 %v1212_v40, %s1915_s20 }
  0xdd   : > { %v869_v43 = vpop.permute.xlu1 %868 }
  0xde   : > { %v839_v45 = vpop.permute.xlu0 %838  ;;  %v953_v46 = vsel %vm950_vm15, %v944_v42, %v869_v43 }
  0xdf   : > { %1837 = vmatprep.mubr.msk.f32.mxu0 %vm971_vm1, %v953_v46  ;;  %v945_v54 = vsel %vm941_vm14, %v936_v53, %v839_v45 }
  0xe1   : > { %v747_v49 = vpop.permute.xlu1 %746 }
  0xe2   : > { %v653_v50 = vpop.permute.xlu0 %652  ;;  %v920_v20 = vsel %vm914_vm11, %v911_v18, %v747_v49  ;;  %v1548_v18 = vld [vmem:[%s2581_s3 + $0x18] sm:$0xff] }
  0xe3   : > { %v894_v30 = vsel %vm528_vm0, %v2209_v28, %v653_v50 }
  0xe5   : > { %v871_v57 = vpop.permute.xlu1 %870 }
  0xe6   : > { %v777_v58 = vpop.permute.xlu0 %776  ;;  %v954_v8 = vsel %vm950_vm15, %v945_v54, %v871_v57 }
  0xe7   : > { %1838 = vmatmul.mubr.msk.f32.gmra.mxu0 %vm971_vm1, %v954_v8  ;;  %v928_v11 = vsel %vm923_vm12, %v919_v9, %v777_v58 }
  0xe9   : > { %v685_v44 = vpop.permute.xlu1 %684 }
  0xea   : > { %v655_v56 = vpop.permute.xlu0 %654  ;;  %v903_v0 = vsel %vm896_vm8, %v894_v30, %v685_v44 }
  0xeb   : > { %v895_v31 = vsel %vm528_vm0, %v2225_v32, %v655_v56  ;;  %vm1509_vm0 = vcmask 326656  }
  0xed   : > { %v809_v59 = vpop.permute.xlu1 %808 }
  0xee   : > { %v779_v60 = vpop.permute.xlu0 %778  ;;  %v937_v12 = vsel %vm932_vm13, %v928_v11, %v809_v59  ;;  %v1553_v11 = vld [vmem:[%s2581_s3 + $0x40] sm:$0xff] }
  0xef   : > { %v929_v21 = vsel %vm923_vm12, %v920_v20, %v779_v60  ;;  %1846 = vmatprep.subr.mxu1 %v1553_v11  ;;  %v1546_v20 = vld [vmem:[%s2581_s3 + $0x8] sm:$0xff] }
  0xf0   : > { %1847 = vmatpush3.msra.mxu1 %v1553_v11 }
  0xf1   : > { %v717_v61 = vpop.permute.xlu1 %716 }
  0xf2   : > { %v687_v62 = vpop.permute.xlu0 %686  ;;  %v912_v36 = vsel %vm905_vm10, %v903_v0, %v717_v61 }
  0xf3   : > { %v904_v35 = vsel %vm896_vm8, %v895_v31, %v687_v62 }
  0xf5   : > { %v841_v63 = vpop.permute.xlu1 %840 }
  0xf6   : > { %v811_v2 = vpop.permute.xlu0 %810  ;;  %v946_v13 = vsel %vm941_vm14, %v937_v12, %v841_v63 }
  0xf7   : > { %v938_v23 = vsel %vm932_vm13, %v929_v21, %v811_v2 }
  0xf9   : > { %v749_v6 = vpop.permute.xlu1 %748 }
  0xfa   : > { %v719_v7 = vpop.permute.xlu0 %718  ;;  %v921_v39 = vsel %vm914_vm11, %v912_v36, %v749_v6 }
  0xfb   : > { %v913_v37 = vsel %vm905_vm10, %v904_v35, %v719_v7 }
  0xfd   : > { %v873_v14 = vpop.permute.xlu1 %872 }
  0xfe   : > { %v843_v15 = vpop.permute.xlu0 %842  ;;  %v955_v17 = vsel %vm950_vm15, %v946_v13, %v873_v14  ;;  %v1552_v13 = vld [vmem:[%s2581_s3 + $0x38] sm:$0xff]  ;;  %v1551_v14 = vld [vmem:[%s2581_s3 + $0x30] sm:$0xff] }
  0xff   : > { %1840 = vmatprep.mubr.msk.f32.mxu0 %vm971_vm1, %v955_v17  ;;  %v947_v26 = vsel %vm941_vm14, %v938_v23, %v843_v15  ;;  %1848 = vmatprep.subr.mxu1 %v1552_v13  ;;  %v1550_v17 = vld [vmem:[%s2581_s3 + $0x28] sm:$0xff] }
 0x100   : > { %1849 = vmatpush3.msra.mxu1 %v1552_v13 }
 0x101   : > { %v781_v55 = vpop.permute.xlu1 %780  ;;  %1850 = vmatprep.subr.mxu1 %v1551_v14 }
 0x102   : > { %v751_v19 = vpop.permute.xlu0 %750  ;;  %v930_v42 = vsel %vm923_vm12, %v921_v39, %v781_v55  ;;  %1851 = vmatpush3.msra.mxu1 %v1551_v14 }
 0x103   : > { %v922_v32 = vsel %vm914_vm11, %v913_v37, %v751_v19  ;;  %1852 = vmatprep.subr.mxu1 %v1550_v17  ;;  %v1547_v19 = vld [vmem:[%s2581_s3 + $0x10] sm:$0xff] }
 0x104   : > { %1853 = vmatpush3.msra.mxu1 %v1550_v17 }
 0x105   : > { %v783_v10 = vpop.permute.xlu1 %782  ;;  %1854 = vmatprep.subr.mxu1 %v1549_v22 }
 0x106   : > { %v875_v24 = vpop.permute.xlu0 %874  ;;  %v931_v43 = vsel %vm923_vm12, %v922_v32, %v783_v10  ;;  %1855 = vmatpush3.msra.mxu1 %v1549_v22  ;;  %v1545_v10 = vld [vmem:[%s2581_s3] sm:$0xff] }
 0x107   : > { %v956_v25 = vsel %vm950_vm15, %v947_v26, %v875_v24  ;;  %1856 = vmatprep.subr.mxu1 %v1548_v18 }
 0x108   : > { %1841 = vmatmul.mubr.msk.f32.gmra.mxu0 %vm971_vm1, %v956_v25  ;;  %1857 = vmatpush3.msra.mxu1 %v1548_v18 }
 0x109   : > { %v815_v27 = vpop.permute.xlu1 %814  ;;  %1858 = vmatprep.subr.mxu1 %v1547_v19 }
 0x10a   : > { %v813_v29 = vpop.permute.xlu0 %812  ;;  %v940_v45 = vsel %vm932_vm13, %v931_v43, %v815_v27  ;;  %1859 = vmatpush3.msra.mxu1 %v1547_v19 }
 0x10b   : > { %v939_v46 = vsel %vm932_vm13, %v930_v42, %v813_v29  ;;  %1860 = vmatprep.subr.mxu1 %v1546_v20 }
 0x10c   : > { %1861 = vmatpush3.msra.mxu1 %v1546_v20 }
 0x10d   : > { %v847_v38 = vpop.permute.xlu1 %846  ;;  %1862 = vmatprep.subr.mxu1 %v1545_v10 }
 0x10e   : > { %v845_v28 = vpop.permute.xlu0 %844  ;;  %v949_v1 = vsel %vm941_vm14, %v940_v45, %v847_v38  ;;  %1863 = vmatpush3.msra.mxu1 %v1545_v10 }
 0x10f   : > { %v948_v47 = vsel %vm941_vm14, %v939_v46, %v845_v28 }
 0x111   : > { %v879_v48 = vpop.permute.xlu1 %878 }
 0x112   : > { %v877_v49 = vpop.permute.xlu0 %876  ;;  %v958_v50 = vsel %vm950_vm15, %v949_v1, %v879_v48 }
 0x113   : > { %v957_v51 = vsel %vm950_vm15, %v948_v47, %v877_v49  ;;  %v1220_v49 = vld [vmem:[#allocation3 + $0x92] sm:$0xff] }
 0x114   : > { %1843 = vmatprep.mubr.msk.f32.mxu0 %vm971_vm1, %v957_v51 }
 0x115   : > { %1844 = vmatmul.mubr.msk.f32.gmra.mxu0 %vm971_vm1, %v958_v50 }
 0x11d   : > { %v1230_v48 = vpop.permute.xlu0 %1229 }
 0x149   : > { %v1262_v51 = vpop.permute.xlu0 %1261 }
 0x14a   : > { %v2459_v43 = vpop.permute.xlu1 %1403 }
 0x14e   : > { %v2468_v1 = vpop.permute.xlu1 %1435 }
 0x187   : > { %v1836_v53 = vpop.f32.mrf.mxu0 }
 0x188   : > { %v1071_v54 = vadd.f32 %v1836_v53, %v2343_v52 }
 0x189   : > { %v1065_v57 = vpop.f32.mrf.mxu0 }
 0x18a   : > { %v1105_v58 = vmax.f32 %v1071_v54, 0.0  ;;  %v1066_v8 = vadd.f32 %v2343_v52, %v1065_v57 }
 0x18c   : > { %1136 = vst.msk [vmem:[#allocation3 + $0x21] sm:$0xff] %vm896_vm8, %v1105_v58  ;;  %v1104_v44 = vmax.f32 %v1066_v8, 0.0 }
 0x18e   : > { %1134 = vst.msk [vmem:[#allocation3 + $0x11] sm:$0xff] %vm896_vm8, %v1104_v44 }
 0x193   : > { %v1182_v56 = vld [vmem:[#allocation3 + $0x21] sm:$0xff] }
 0x194   : > { %v2349_v59 = vld [vmem:[#allocation3 + $0x20] sm:$0xff]  ;;  %1327 = vrot.lane.b32.xlu0 %v1182_v56, %s1913_s16 }
 0x195   : > { %1295 = vrot.lane.b32.xlu1 %v2349_v59, %s1911_s6  ;;  %v1190_v60 = vld [vmem:[#allocation3 + $0x22] sm:$0xff]  ;;  %v2356_v61 = vld [vmem:[#allocation3 + $0x10] sm:$0xff] }
 0x196   : > { %v1181_v62 = vld [vmem:[#allocation3 + $0x11] sm:$0xff] }
 0x197   : > { %v1166_v7 = vld [vmem:[#allocation3 + $0x12] sm:$0xff] }
 0x198   : > { %1359 = vrot.lane.b32.xlu0 %v1190_v60, %s1916_s23 }
 0x199   : > { %1233 = vrot.lane.b32.xlu1 %v1182_v56, %s1907_s25 }
 0x19c   : > { %1293 = vrot.lane.b32.xlu0 %v2356_v61, %s1911_s6 }
 0x19d   : > { %1265 = vrot.lane.b32.xlu1 %v1190_v60, %s1909_s27 }
 0x1a0   : > { %1325 = vrot.lane.b32.xlu0 %v1181_v62, %s1913_s16 }
 0x1a1   : > { %1389 = vrot.lane.b32.xlu1 %v2349_v59, %s1914_s17 }
 0x1a5   : > { %1421 = vrot.lane.b32.xlu1 %v1182_v56, %s1915_s20  ;;  %v1149_v56 = vld [vmem:[#allocation3] sm:$0xff] }
 0x1a7   : > { %v1839_v63 = vpop.f32.mrf.mxu0 }
 0x1a8   : > { %v1081_v2 = vadd.f32 %v1839_v63, %v2343_v52  ;;  %v1477_v63 = vsel %vm896_vm8, %v1149_v56, %v1230_v48 }
 0x1a9   : > { %1453 = vrot.lane.b32.xlu1 %v1190_v60, %s1917_s24  ;;  %v1075_v3 = vpop.f32.mrf.mxu0 }
 0x1aa   : > { %v1107_v4 = vmax.f32 %v1081_v2, 0.0  ;;  %v1076_v5 = vadd.f32 %v2343_v52, %v1075_v3  ;;  %v1485_v2 = vsel %vm914_vm11, %v1477_v63, %v1262_v51 }
 0x1ac   : > { %1140 = vst.msk [vmem:[#allocation3 + $0x41] sm:$0xff] %vm896_vm8, %v1107_v4  ;;  %v1106_v6 = vmax.f32 %v1076_v5, 0.0 }
 0x1ad   : > { %1231 = vrot.lane.b32.xlu1 %v1181_v62, %s1907_s25 }
 0x1ae   : > { %1138 = vst.msk [vmem:[#allocation3 + $0x31] sm:$0xff] %vm896_vm8, %v1106_v6 }
 0x1b1   : > { %1263 = vrot.lane.b32.xlu1 %v1166_v7, %s1909_s27 }
 0x1b3   : > { %v2372_v9 = vld [vmem:[#allocation3 + $0x40] sm:$0xff] }
 0x1b4   : > { %1299 = vrot.lane.b32.xlu0 %v2372_v9, %s1911_s6  ;;  %v1161_v12 = vld [vmem:[#allocation3 + $0x41] sm:$0xff] }
 0x1b5   : > { %1357 = vrot.lane.b32.xlu1 %v1166_v7, %s1916_s23  ;;  %v1192_v15 = vld [vmem:[#allocation3 + $0x42] sm:$0xff]  ;;  %v1160_v16 = vld [vmem:[#allocation3 + $0x31] sm:$0xff] }
 0x1b6   : > { %v1168_v55 = vld [vmem:[#allocation3 + $0x32] sm:$0xff] }
 0x1b7   : > { %v2410_v23 = vld [vmem:[#allocation3 + $0x30] sm:$0xff] }
 0x1b8   : > { %1237 = vrot.lane.b32.xlu0 %v1161_v12, %s1907_s25 }
 0x1b9   : > { %1331 = vrot.lane.b32.xlu1 %v1161_v12, %s1913_s16 }
 0x1bc   : > { %1363 = vrot.lane.b32.xlu0 %v1192_v15, %s1916_s23 }
 0x1bd   : > { %1269 = vrot.lane.b32.xlu1 %v1192_v15, %s1909_s27 }
 0x1c0   : > { %1235 = vrot.lane.b32.xlu0 %v1160_v16, %s1907_s25 }
 0x1c1   : > { %1393 = vrot.lane.b32.xlu1 %v2372_v9, %s1914_s17 }
 0x1c4   : > { %1267 = vrot.lane.b32.xlu0 %v1168_v55, %s1909_s27 }
 0x1c5   : > { %1425 = vrot.lane.b32.xlu1 %v1161_v12, %s1915_s20 }
 0x1c8   : > { %v1842_v21 = vpop.f32.mrf.mxu0  ;;  %1391 = vrot.lane.b32.xlu0 %v2410_v23, %s1914_s17 }
 0x1c9   : > { %v1091_v26 = vadd.f32 %v1842_v21, %v2343_v52  ;;  %1457 = vrot.lane.b32.xlu1 %v1192_v15, %s1917_s24 }
 0x1ca   : > { %v1085_v24 = vpop.f32.mrf.mxu0 }
 0x1cb   : > { %v1109_v25 = vmax.f32 %v1091_v26, 0.0  ;;  %v1086_v27 = vadd.f32 %v2343_v52, %v1085_v24 }
 0x1cc   : > { %1423 = vrot.lane.b32.xlu0 %v1160_v16, %s1915_s20 }
 0x1cd   : > { %1144 = vst.msk [vmem:[#allocation3 + $0x61] sm:$0xff] %vm896_vm8, %v1109_v25  ;;  %v1108_v29 = vmax.f32 %v1086_v27, 0.0  ;;  %1297 = vrot.lane.b32.xlu1 %v2410_v23, %s1911_s6 }
 0x1cf   : > { %1142 = vst.msk [vmem:[#allocation3 + $0x51] sm:$0xff] %vm896_vm8, %v1108_v29 }
 0x1d0   : > { %1361 = vrot.lane.b32.xlu0 %v1168_v55, %s1916_s23 }
 0x1d1   : > { %1329 = vrot.lane.b32.xlu1 %v1160_v16, %s1913_s16 }
 0x1d4   : > { %v2427_v30 = vld [vmem:[#allocation3 + $0x60] sm:$0xff] }
 0x1d5   : > { %v1845_v31 = vpop.f32.mrf.mxu0  ;;  %1303 = vrot.lane.b32.xlu0 %v2427_v30, %s1911_s6  ;;  %1455 = vrot.lane.b32.xlu1 %v1168_v55, %s1917_s24  ;;  %v1163_v36 = vld [vmem:[#allocation3 + $0x61] sm:$0xff] }
 0x1d6   : > { %v1101_v33 = vadd.f32 %v1845_v31, %v2343_v52  ;;  %v1194_v38 = vld [vmem:[#allocation3 + $0x62] sm:$0xff]  ;;  %v1162_v28 = vld [vmem:[#allocation3 + $0x51] sm:$0xff] }
 0x1d7   : > { %v1095_v34 = vpop.f32.mrf.mxu0  ;;  %v1170_v39 = vld [vmem:[#allocation3 + $0x52] sm:$0xff] }
 0x1d8   : > { %v1111_v0 = vmax.f32 %v1101_v33, 0.0  ;;  %v1096_v35 = vadd.f32 %v2343_v52, %v1095_v34  ;;  %v2445_v32 = vld [vmem:[#allocation3 + $0x50] sm:$0xff] }
 0x1d9   : > { %1241 = vrot.lane.b32.xlu0 %v1163_v36, %s1907_s25  ;;  %1335 = vrot.lane.b32.xlu1 %v1163_v36, %s1913_s16 }
 0x1da   : > { %1148 = vst.msk [vmem:[#allocation3 + $0x81] sm:$0xff] %vm896_vm8, %v1111_v0  ;;  %v1110_v37 = vmax.f32 %v1096_v35, 0.0 }
 0x1dc   : > { %1146 = vst.msk [vmem:[#allocation3 + $0x71] sm:$0xff] %vm896_vm8, %v1110_v37 }
 0x1dd   : > { %1367 = vrot.lane.b32.xlu0 %v1194_v38, %s1916_s23  ;;  %1273 = vrot.lane.b32.xlu1 %v1194_v38, %s1909_s27 }
 0x1e1   : > { %1239 = vrot.lane.b32.xlu0 %v1162_v28, %s1907_s25  ;;  %1397 = vrot.lane.b32.xlu1 %v2427_v30, %s1914_s17  ;;  %v1180_v40 = vld [vmem:[#allocation3 + $0x80] sm:$0xff] }
 0x1e2   : > { %v1188_v41 = vld [vmem:[#allocation3 + $0x81] sm:$0xff] }
 0x1e3   : > { %v1196_v42 = vld [vmem:[#allocation3 + $0x82] sm:$0xff]  ;;  %v2461_v45 = vld [vmem:[#allocation3 + $0x70] sm:$0xff] }
 0x1e4   : > { %v1187_v46 = vld [vmem:[#allocation3 + $0x71] sm:$0xff] }
 0x1e5   : > { %1271 = vrot.lane.b32.xlu0 %v1170_v39, %s1909_s27  ;;  %1429 = vrot.lane.b32.xlu1 %v1163_v36, %s1915_s20  ;;  %v1195_v47 = vld [vmem:[#allocation3 + $0x72] sm:$0xff] }
 0x1e9   : > { %1395 = vrot.lane.b32.xlu0 %v2445_v32, %s1914_s17  ;;  %1461 = vrot.lane.b32.xlu1 %v1194_v38, %s1917_s24 }
 0x1ed   : > { %1427 = vrot.lane.b32.xlu0 %v1162_v28, %s1915_s20  ;;  %1301 = vrot.lane.b32.xlu1 %v2445_v32, %s1911_s6 }
 0x1f1   : > { %1365 = vrot.lane.b32.xlu0 %v1170_v39, %s1916_s23  ;;  %1333 = vrot.lane.b32.xlu1 %v1162_v28, %s1913_s16 }
 0x1f5   : > { %1307 = vrot.lane.b32.xlu0 %v1180_v40, %s1911_s6  ;;  %1459 = vrot.lane.b32.xlu1 %v1170_v39, %s1917_s24 }
 0x1f9   : > { %1339 = vrot.lane.b32.xlu0 %v1188_v41, %s1913_s16  ;;  %1371 = vrot.lane.b32.xlu1 %v1196_v42, %s1916_s23 }
 0x1fd   : > { %1401 = vrot.lane.b32.xlu0 %v1180_v40, %s1914_s17  ;;  %1305 = vrot.lane.b32.xlu1 %v2461_v45, %s1911_s6  ;;  %s1793_s6 = sshll.u32 %s2585_s19, 6 }
 0x201   : > { %1433 = vrot.lane.b32.xlu0 %v1188_v41, %s1915_s20  ;;  %1337 = vrot.lane.b32.xlu1 %v1187_v46, %s1913_s16 }
 0x205   : > { %1243 = vrot.lane.b32.xlu0 %v1187_v46, %s1907_s25  ;;  %1369 = vrot.lane.b32.xlu1 %v1195_v47, %s1916_s23 }
 0x206   : > { %v1328_v54 = vpop.permute.xlu0 %1327 }
 0x207   : > { %v1296_v50 = vpop.permute.xlu1 %1295 }
 0x209   : > { %1275 = vrot.lane.b32.xlu0 %v1195_v47, %s1909_s27  ;;  %1467 = vrot.lane.b32.xlu1 %v1220_v49, %s1917_s24 }
 0x20a   : > { %v1360_v58 = vpop.permute.xlu0 %1359 }
 0x20b   : > { %v1234_v52 = vpop.permute.xlu1 %1233 }
 0x20c   : > { %v1479_v33 = vsel %vm896_vm8, %v2349_v59, %v1234_v52 }
 0x20d   : > { %1399 = vrot.lane.b32.xlu0 %v2461_v45, %s1914_s17 }
 0x20e   : > { %v1294_v60 = vpop.permute.xlu0 %1293 }
 0x20f   : > { %v1266_v53 = vpop.permute.xlu1 %1265  ;;  %v1493_v5 = vsel %vm932_vm13, %v1485_v2, %v1294_v60 }
 0x210   : > { %v1487_v34 = vsel %vm914_vm11, %v1479_v33, %v1266_v53 }
 0x211   : > { %1431 = vrot.lane.b32.xlu0 %v1187_v46, %s1915_s20  ;;  %s224_s20 = scalar_lea.vmem %s2583_s5, %s1793_s6 }
 0x212   : > { %v1326_v3 = vpop.permute.xlu0 %1325 }
 0x213   : > { %v1390_v57 = vpop.permute.xlu1 %1389  ;;  %v1501_v6 = vsel %vm950_vm15, %v1493_v5, %v1326_v3 }
 0x215   : > { %1463 = vrot.lane.b32.xlu0 %v1195_v47, %s1917_s24 }
 0x217   : > { %v1422_v8 = vpop.permute.xlu1 %1421 }
 0x219   : > { %1465 = vrot.lane.b32.xlu0 %v1196_v42, %s1917_s24 }
 0x21b   : > { %v1454_v44 = vpop.permute.xlu1 %1453 }
 0x21f   : > { %v1232_v62 = vpop.permute.xlu1 %1231 }
 0x220   : > { %v1478_v26 = vsel %vm896_vm8, %v2356_v61, %v1232_v62 }
 0x223   : > { %v1264_v4 = vpop.permute.xlu1 %1263 }
 0x224   : > { %v1486_v25 = vsel %vm914_vm11, %v1478_v26, %v1264_v4 }
 0x225   : > { %v1494_v27 = vsel %vm932_vm13, %v1486_v25, %v1296_v50 }
 0x226   : > { %v1300_v7 = vpop.permute.xlu0 %1299  ;;  %v1502_v0 = vsel %vm950_vm15, %v1494_v27, %v1328_v54 }
 0x227   : > { %v1358_v11 = vpop.permute.xlu1 %1357  ;;  %v1511_v38 = vsel %vm1509_vm0, %v1502_v0, %v1360_v58 }
 0x228   : > { %v1510_v12 = vsel %vm1509_vm0, %v1501_v6, %v1358_v11 }
 0x229   : > { %v1519_v13 = vsel %vm1518_vm3, %v1510_v12, %v1390_v57 }
 0x22a   : > { %v1528_v14 = vsel %vm1527_vm4, %v1519_v13, %v1422_v8  ;;  %v1238_v15 = vpop.permute.xlu0 %1237 }
 0x22b   : > { %v1332_v17 = vpop.permute.xlu1 %1331  ;;  %v1537_v22 = vsel %vm1536_vm5, %v1528_v14, %v1454_v44  ;;  %v1481_v3 = vsel %vm896_vm8, %v2372_v9, %v1238_v15 }
 0x22c   : > { %1864 = vmatprep.mubr.msk.f32.mxu1 %vm1561_vm6, %v1537_v22 }
 0x22e   : > { %v1364_v16 = vpop.permute.xlu0 %1363 }
 0x22f   : > { %v1270_v18 = vpop.permute.xlu1 %1269 }
 0x230   : > { %v1489_v4 = vsel %vm914_vm11, %v1481_v3, %v1270_v18 }
 0x232   : > { %v1236_v55 = vpop.permute.xlu0 %1235 }
 0x233   : > { %v1394_v19 = vpop.permute.xlu1 %1393  ;;  %v1480_v8 = vsel %vm896_vm8, %v2410_v23, %v1236_v55 }
 0x236   : > { %v1268_v20 = vpop.permute.xlu0 %1267 }
 0x237   : > { %v1426_v21 = vpop.permute.xlu1 %1425  ;;  %v1488_v60 = vsel %vm914_vm11, %v1480_v8, %v1268_v20 }
 0x238   : > { %v1496_v62 = vsel %vm932_vm13, %v1488_v60, %v1300_v7 }
 0x239   : > { %v1504_v5 = vsel %vm950_vm15, %v1496_v62, %v1332_v17 }
 0x23a   : > { %v1392_v10 = vpop.permute.xlu0 %1391  ;;  %v1513_v13 = vsel %vm1509_vm0, %v1504_v5, %v1364_v16 }
 0x23b   : > { %v1458_v24 = vpop.permute.xlu1 %1457  ;;  %v1520_v39 = vsel %vm1518_vm3, %v1511_v38, %v1392_v10 }
 0x23e   : > { %v1424_v29 = vpop.permute.xlu0 %1423 }
 0x23f   : > { %v1298_v31 = vpop.permute.xlu1 %1297  ;;  %v1529_v59 = vsel %vm1527_vm4, %v1520_v39, %v1424_v29 }
 0x240   : > { %v1495_v35 = vsel %vm932_vm13, %v1487_v34, %v1298_v31 }
 0x242   : > { %v1362_v36 = vpop.permute.xlu0 %1361 }
 0x243   : > { %v1330_v37 = vpop.permute.xlu1 %1329 }
 0x244   : > { %v1503_v61 = vsel %vm950_vm15, %v1495_v35, %v1330_v37 }
 0x245   : > { %v1512_v28 = vsel %vm1509_vm0, %v1503_v61, %v1362_v36 }
 0x246   : > { %v1521_v40 = vsel %vm1518_vm3, %v1512_v28, %v1394_v19 }
 0x247   : > { %v1304_v41 = vpop.permute.xlu0 %1303  ;;  %v1456_v42 = vpop.permute.xlu1 %1455  ;;  %v1530_v46 = vsel %vm1527_vm4, %v1521_v40, %v1426_v21 }
 0x248   : > { %v1538_v47 = vsel %vm1536_vm5, %v1529_v59, %v1456_v42  ;;  %v1539_v48 = vsel %vm1536_vm5, %v1530_v46, %v1458_v24 }
 0x249   : > { %1865 = vmatmul.mubr.msk.f32.vlgmr.msra.gmra.mxu1 %vm1561_vm6, %v1538_v47 }
 0x24a   : > { %1867 = vmatprep.mubr.msk.f32.mxu1 %vm1561_vm6, %v1539_v48 }
 0x24b   : > { %v1242_v49 = vpop.permute.xlu0 %1241  ;;  %v1336_v50 = vpop.permute.xlu1 %1335 }
 0x24c   : > { %v1483_v37 = vsel %vm896_vm8, %v2427_v30, %v1242_v49 }
 0x24f   : > { %v1368_v51 = vpop.permute.xlu0 %1367  ;;  %v1274_v52 = vpop.permute.xlu1 %1273 }
 0x253   : > { %v1240_v53 = vpop.permute.xlu0 %1239  ;;  %v1398_v54 = vpop.permute.xlu1 %1397 }
 0x254   : > { %v1482_v25 = vsel %vm896_vm8, %v2445_v32, %v1240_v53  ;;  %v1491_v32 = vsel %vm914_vm11, %v1483_v37, %v1274_v52 }
 0x257   : > { %v1272_v57 = vpop.permute.xlu0 %1271  ;;  %v1430_v58 = vpop.permute.xlu1 %1429 }
 0x258   : > { %v1490_v31 = vsel %vm914_vm11, %v1482_v25, %v1272_v57 }
 0x259   : > { %v1498_v35 = vsel %vm932_vm13, %v1490_v31, %v1304_v41 }
 0x25b   : > { %v1396_v44 = vpop.permute.xlu0 %1395  ;;  %v1462_v56 = vpop.permute.xlu1 %1461 }
 0x25c   : > { %v1522_v7 = vsel %vm1518_vm3, %v1513_v13, %v1396_v44 }
 0x25f   : > { %v1428_v63 = vpop.permute.xlu0 %1427  ;;  %v1302_v2 = vpop.permute.xlu1 %1301 }
 0x260   : > { %v1497_v6 = vsel %vm932_vm13, %v1489_v4, %v1302_v2  ;;  %v1531_v9 = vsel %vm1527_vm4, %v1522_v7, %v1428_v63 }
 0x263   : > { %v1366_v11 = vpop.permute.xlu0 %1365  ;;  %v1334_v12 = vpop.permute.xlu1 %1333 }
 0x264   : > { %v1505_v23 = vsel %vm950_vm15, %v1497_v6, %v1334_v12 }
 0x265   : > { %v1514_v14 = vsel %vm1509_vm0, %v1505_v23, %v1366_v11 }
 0x266   : > { %v1523_v22 = vsel %vm1518_vm3, %v1514_v14, %v1398_v54 }
 0x267   : > { %v1308_v15 = vpop.permute.xlu0 %1307  ;;  %v1460_v18 = vpop.permute.xlu1 %1459  ;;  %v1532_v17 = vsel %vm1527_vm4, %v1523_v22, %v1430_v58  ;;  %v1781_v58 = vld [vmem:[%s2582_s4] ss:$0 sm:$0xff] }
 0x268   : > { %v1540_v55 = vsel %vm1536_vm5, %v1531_v9, %v1460_v18  ;;  %v1541_v19 = vsel %vm1536_vm5, %v1532_v17, %v1462_v56 }
 0x269   : > { %1868 = vmatmul.mubr.msk.f32.gmra.mxu1 %vm1561_vm6, %v1540_v55 }
 0x26a   : > { %1870 = vmatprep.mubr.msk.f32.mxu1 %vm1561_vm6, %v1541_v19 }
 0x26b   : > { %v1340_v16 = vpop.permute.xlu0 %1339  ;;  %v1372_v21 = vpop.permute.xlu1 %1371 }
 0x26f   : > { %v1402_v20 = vpop.permute.xlu0 %1401  ;;  %v1306_v10 = vpop.permute.xlu1 %1305 }
 0x270   : > { %v1499_v28 = vsel %vm932_vm13, %v1491_v32, %v1306_v10 }
 0x273   : > { %v1434_v26 = vpop.permute.xlu0 %1433  ;;  %v1338_v33 = vpop.permute.xlu1 %1337 }
 0x274   : > { %v1507_v40 = vsel %vm950_vm15, %v1499_v28, %v1338_v33 }
 0x277   : > { %v1244_v24 = vpop.permute.xlu0 %1243  ;;  %v1370_v38 = vpop.permute.xlu1 %1369 }
 0x278   : > { %v1484_v27 = vsel %vm896_vm8, %v2461_v45, %v1244_v24  ;;  %v1506_v45 = vsel %vm950_vm15, %v1498_v35, %v1336_v50  ;;  %v1516_v41 = vsel %vm1509_vm0, %v1507_v40, %v1370_v38 }
 0x279   : > { %v1515_v42 = vsel %vm1509_vm0, %v1506_v45, %v1368_v51  ;;  %v1525_v49 = vsel %vm1518_vm3, %v1516_v41, %v1402_v20 }
 0x27a   : > { %v1534_v54 = vsel %vm1527_vm4, %v1525_v49, %v1434_v26 }
 0x27b   : > { %v1276_v29 = vpop.permute.xlu0 %1275  ;;  %v1468_v53 = vpop.permute.xlu1 %1467 }
 0x27c   : > { %v1492_v34 = vsel %vm914_vm11, %v1484_v27, %v1276_v29 }
 0x27d   : > { %v1500_v0 = vsel %vm932_vm13, %v1492_v34, %v1308_v15 }
 0x27e   : > { %v1508_v61 = vsel %vm950_vm15, %v1500_v0, %v1340_v16 }
 0x27f   : > { %v1400_v36 = vpop.permute.xlu0 %1399  ;;  %v1517_v59 = vsel %vm1509_vm0, %v1508_v61, %v1372_v21 }
 0x280   : > { %v1524_v30 = vsel %vm1518_vm3, %v1515_v42, %v1400_v36  ;;  %v1526_v46 = vsel %vm1518_vm3, %v1517_v59, %v2459_v43 }
 0x281   : > { %v1535_v52 = vsel %vm1527_vm4, %v1526_v46, %v2468_v1 }
 0x282   : > { %v1544_v43 = vsel %vm1536_vm5, %v1535_v52, %v1468_v53 }
 0x283   : > { %v1432_v39 = vpop.permute.xlu0 %1431 }
 0x284   : > { %v1533_v47 = vsel %vm1527_vm4, %v1524_v30, %v1432_v39 }
 0x287   : > { %v1464_v48 = vpop.permute.xlu0 %1463 }
 0x288   : > { %v1542_v50 = vsel %vm1536_vm5, %v1533_v47, %v1464_v48 }
 0x289   : > { %1871 = vmatmul.mubr.msk.f32.gmra.mxu1 %vm1561_vm6, %v1542_v50 }
 0x28b   : > { %v1466_v51 = vpop.permute.xlu0 %1465 }
 0x28c   : > { %v1543_v57 = vsel %vm1536_vm5, %v1534_v54, %v1466_v51 }
 0x28d   : > { %1873 = vmatprep.mubr.msk.f32.mxu1 %vm1561_vm6, %v1543_v57 }
 0x28e   : > { %1874 = vmatmul.mubr.msk.f32.gmra.mxu1 %vm1561_vm6, %v1544_v43 }
 0x309   : > { %v1866_v8 = vpop.f32.mrf.mxu1 }
 0x30a   : > { %v1658_v44 = vadd.f32 %v1866_v8, %v1781_v58 }
 0x30b   : > { %v1652_v1 = vpop.f32.mrf.mxu1 }
 0x30c   : > { %v1692_v56 = vmax.f32 %v1658_v44, 0.0  ;;  %v1653_v60 = vadd.f32 %v1781_v58, %v1652_v1 }
 0x30e   : > { %1700 = vst.msk [vmem:[%s224_s20 + $0x8] sm:$0xff] %vm896_vm8, %v1692_v56  ;;  %v1691_v62 = vmax.f32 %v1653_v60, 0.0 }
 0x310   : > { %1699 = vst.msk [vmem:[%s224_s20] sm:$0xff] %vm896_vm8, %v1691_v62 }
 0x329   : > { %v1869_v63 = vpop.f32.mrf.mxu1 }
 0x32a   : > { %v1668_v2 = vadd.f32 %v1869_v63, %v1781_v58 }
 0x32b   : > { %v1662_v3 = vpop.f32.mrf.mxu1 }
 0x32c   : > { %v1694_v4 = vmax.f32 %v1668_v2, 0.0  ;;  %v1663_v5 = vadd.f32 %v1781_v58, %v1662_v3 }
 0x32e   : > { %1702 = vst.msk [vmem:[%s224_s20 + $0x18] sm:$0xff] %vm896_vm8, %v1694_v4  ;;  %v1693_v6 = vmax.f32 %v1663_v5, 0.0 }
 0x330   : > { %1701 = vst.msk [vmem:[%s224_s20 + $0x10] sm:$0xff] %vm896_vm8, %v1693_v6 }
 0x349   : > { %v1872_v11 = vpop.f32.mrf.mxu1 }
 0x34a   : > { %v1678_v12 = vadd.f32 %v1872_v11, %v1781_v58 }
 0x34b   : > { %v1672_v23 = vpop.f32.mrf.mxu1 }
 0x34c   : > { %v1696_v13 = vmax.f32 %v1678_v12, 0.0  ;;  %v1673_v14 = vadd.f32 %v1781_v58, %v1672_v23 }
 0x34e   : > { %1704 = vst.msk [vmem:[%s224_s20 + $0x28] sm:$0xff] %vm896_vm8, %v1696_v13  ;;  %v1695_v7 = vmax.f32 %v1673_v14, 0.0  ;;  %v1875_v22 = vpop.f32.mrf.mxu1 }
 0x34f   : > { %v1688_v9 = vadd.f32 %v1875_v22, %v1781_v58 }
 0x350   : > { %1703 = vst.msk [vmem:[%s224_s20 + $0x20] sm:$0xff] %vm896_vm8, %v1695_v7  ;;  %v1682_v15 = vpop.f32.mrf.mxu1 }
 0x351   : > { %v1698_v18 = vmax.f32 %v1688_v9, 0.0  ;;  %v1683_v17 = vadd.f32 %v1781_v58, %v1682_v15 }
 0x353   : > { %1706 = vst.msk [vmem:[%s224_s20 + $0x38] sm:$0xff] %vm896_vm8, %v1698_v18  ;;  %v1697_v55 = vmax.f32 %v1683_v17, 0.0 }
 0x355   : > { %1705 = vst.msk [vmem:[%s224_s20 + $0x30] sm:$0xff] %vm896_vm8, %v1697_v55 }
 0x356 PF: > { %s15_s18 = sadd.s32 1, %s1903_s18  }
 0x357   : > { %p12_p4 = scmp.ge.s32.totalorder %s15_s18, 4  }
 0x359   :  { %14 = sbr.rel (!%p12_p4) target bundleno = 1 (0x1), region = 80 }

</bundles_post_ra>
